<compile_context>
chip_gen: v7x
topology: tpu7x:2x2x1
jax: 0.10.0
libtpu: 0.0.40
codegen_flags: <defaults>
</compile_context>

<pallas_src>
import functools
import math

import jax
import jax.numpy as jnp
from jax.experimental import pallas as pl
from jax.experimental.pallas import tpu as pltpu


# ----------------------------------------------------------------------------
# In-kernel helpers
# ----------------------------------------------------------------------------
def _mm(a, b):
    """MXU matmul with bf16 operands and f32 accumulation (b already bf16)."""
    return jnp.dot(a.astype(jnp.bfloat16), b, preferred_element_type=jnp.float32)


def _ln(z, g, b, eps=1e-5):
    mu = jnp.mean(z, axis=-1, keepdims=True)
    var = jnp.mean(jnp.square(z - mu), axis=-1, keepdims=True)
    return (z - mu) * jax.lax.rsqrt(var + eps) * g + b


def _encoder_core(xcol_ref, mask_ref, w1_ref, s1_ref, w2_ref, s2_ref, pe_ref,
                  wq_ref, wk_ref, wv_ref, rb_ref, tog_ref, tob_ref,
                  g1_ref, b1_ref, fw1_ref, fb1_ref, fw2_ref, fb2_ref,
                  g2_ref, b2_ref, num_heads):
    """Per-batch CasualConvTran trunk.  Returns (out_seq (L,E), gap (1,E))."""
    L, E = pe_ref.shape
    H = num_heads
    D = E // H
    scale = float(E) ** -0.5                 # module uses emb_size**-0.5

    # --- Conv1 (k=3, pad=1) as a single im2col matmul; BN scale pre-folded --
    # TODO(synk): PyTorch nn.GELU() uses exact erf; tanh approximation here.
    h1 = jax.nn.gelu(_mm(xcol_ref[...], w1_ref[...]) + s1_ref[...],
                     approximate=True)                                # (L, E)

    # --- Conv2 (k=3, pad=1): 3-tap matmuls, row shifts via 0/1 shift matrices
    # Shift matrices are exact in bf16, so the whole tap chain stays on the
    # fast bf16 MXU path (identical numerics to shifting f32 then casting).
    r = jax.lax.broadcasted_iota(jnp.int32, (L, L), 0)
    c = jax.lax.broadcasted_iota(jnp.int32, (L, L), 1)
    s_dn = (r == c + 1).astype(jnp.bfloat16)  # (s_dn @ h)[l] = h[l-1], row 0 -> 0
    s_up = (r + 1 == c).astype(jnp.bfloat16)  # (s_up @ h)[l] = h[l+1], last -> 0
    h1b = h1.astype(jnp.bfloat16)
    h_prev = jnp.dot(s_dn, h1b, preferred_element_type=jnp.float32)
    h_next = jnp.dot(s_up, h1b, preferred_element_type=jnp.float32)
    x_src = (_mm(h_prev, w2_ref[0])
             + jnp.dot(h1b, w2_ref[1], preferred_element_type=jnp.float32)
             + _mm(h_next, w2_ref[2]) + s2_ref[...])
    x_src = jax.nn.gelu(x_src, approximate=True)                      # (L, E)

    # --- tAPE ('Sin') positional encoding + full-width QKV projections ------
    x_pos = x_src + pe_ref[...]
    xb = x_pos.astype(jnp.bfloat16)
    q = jnp.dot(xb, wq_ref[...], preferred_element_type=jnp.float32)  # (L, E)
    k = jnp.dot(xb, wk_ref[...], preferred_element_type=jnp.float32)
    v = jnp.dot(xb, wv_ref[...], preferred_element_type=jnp.float32)

    # --- Attention_Rel_Scl: static loop over heads, lane-dense (L,E) output -
    mask_is_zero = (mask_ref[...] == 0.0)                             # (1, L)
    col = jax.lax.broadcasted_iota(jnp.int32, (1, E), 1)
    attn = jnp.zeros((L, E), jnp.float32)
    for h in range(H):                                                # unrolled
        hm = ((col >= h * D) & (col < (h + 1) * D)).astype(jnp.float32)
        # Masking Q alone selects head h's lanes in the score contraction.
        s = jax.lax.dot_general(q * hm, k, (((1,), (1,)), ((), ())),
                                preferred_element_type=jnp.float32) * scale
        s = jnp.where(mask_is_zero, -10000.0, s)
        s = s - jnp.max(s, axis=-1, keepdims=True)
        p = jnp.exp(s)
        p = p / jnp.sum(p, axis=-1, keepdims=True)
        p = p + rb_ref[h]                    # relative bias added AFTER softmax
        attn = attn + jnp.dot(p, v * hm, preferred_element_type=jnp.float32)

    # --- to_out LN, residual + LN, FFN, residual + LN2, GAP ------------------
    a = _ln(attn, tog_ref[...], tob_ref[...])            # attention to_out LN
    att = _ln(x_src + a, g1_ref[...], b1_ref[...])       # residual + LayerNorm
    hdd = jnp.maximum(_mm(att, fw1_ref[...]) + fb1_ref[...], 0.0)
    ff = _mm(hdd, fw2_ref[...]) + fb2_ref[...]
    out = _ln(att + ff, g2_ref[...], b2_ref[...])        # residual + LayerNorm2
    gap = jnp.mean(out, axis=0, keepdims=True)           # AdaptiveAvgPool1d(1)
    return out, gap


def fused_kernel_inv(xcol_ref, mask_ref, w1_ref, s1_ref, w2_ref, s2_ref, pe_ref,
                     wq_ref, wk_ref, wv_ref, rb_ref, tog_ref, tob_ref,
                     g1_ref, b1_ref, fw1_ref, fb1_ref, fw2_ref, fb2_ref,
                     g2_ref, b2_ref, ow_ref, ob_ref,
                     seq_ref, gap_ref, logits_ref, *, num_heads):
    out, gap = _encoder_core(xcol_ref, mask_ref, w1_ref, s1_ref, w2_ref, s2_ref,
                             pe_ref, wq_ref, wk_ref, wv_ref, rb_ref, tog_ref,
                             tob_ref, g1_ref, b1_ref, fw1_ref, fb1_ref,
                             fw2_ref, fb2_ref, g2_ref, b2_ref, num_heads)
    seq_ref[...] = out
    gap_ref[...] = gap
    logits_ref[...] = _mm(gap, ow_ref[...]) + ob_ref[...]


def fused_kernel_dom(xcol_ref, mask_ref, w1_ref, s1_ref, w2_ref, s2_ref, pe_ref,
                     wq_ref, wk_ref, wv_ref, rb_ref, tog_ref, tob_ref,
                     g1_ref, b1_ref, fw1_ref, fb1_ref, fw2_ref, fb2_ref,
                     g2_ref, b2_ref, w1h_ref, b1h_ref, w2h_ref, b2h_ref,
                     seq_ref, gap_ref, inf_ref, irr_ref, *, num_heads):
    out, gap = _encoder_core(xcol_ref, mask_ref, w1_ref, s1_ref, w2_ref, s2_ref,
                             pe_ref, wq_ref, wk_ref, wv_ref, rb_ref, tog_ref,
                             tob_ref, g1_ref, b1_ref, fw1_ref, fb1_ref,
                             fw2_ref, fb2_ref, g2_ref, b2_ref, num_heads)
    seq_ref[...] = out
    gap_ref[...] = gap
    # Half-width heads: weights are zero-padded to full E in the wrapper, so
    # matmul against the whole GAP vector is exactly out1(gap[:,:E/2]) etc.
    inf_ref[...] = _mm(gap, w1h_ref[...]) + b1h_ref[...]
    irr_ref[...] = _mm(gap, w2h_ref[...]) + b2h_ref[...]


# ----------------------------------------------------------------------------
# Spec helpers
# ----------------------------------------------------------------------------
def _const_spec(shape):
    if len(shape) == 2:
        return pl.BlockSpec(shape, lambda b: (0, 0))
    return pl.BlockSpec(shape, lambda b: (0, 0, 0))


# ----------------------------------------------------------------------------
# Fused per-role wrapper (single pallas_call, grid=(B,))
# ----------------------------------------------------------------------------
def casual_convtran_fused(p, x, mask, role, num_heads, eps=1e-5):
    B, L, Cin = x.shape
    E = p['conv1_w'].shape[0]
    H = num_heads
    F = p['ff_w1'].shape[0]

    def fold_conv(w, cb, g, bb, m, v):
        # torch conv weight (Cout, Cin, 3).  BN(eval) scale folded into the
        # weight; conv bias folded into the additive BN shift.
        scale = g / jnp.sqrt(v + eps)
        shift = ((cb - m) * scale + bb).reshape(1, -1)
        wk = jnp.transpose(w, (2, 1, 0)) * scale[None, None, :]   # (3, Cin, Cout)
        return wk, shift

    w1k, s1 = fold_conv(p['conv1_w'], p['conv1_b'], p['bn1_g'], p['bn1_b'],
                        p['bn1_m'], p['bn1_v'])
    w2k, s2 = fold_conv(p['conv2_w'], p['conv2_b'], p['bn2_g'], p['bn2_b'],
                        p['bn2_m'], p['bn2_v'])
    w1_im2col = w1k.reshape(3 * Cin, E).astype(jnp.bfloat16)      # (3*Cin, E)
    w2_taps = w2k.astype(jnp.bfloat16)                            # (3, E, E)

    # im2col for conv1 built as plain-JAX glue (pad + shifted concat).
    xp = jnp.pad(x.astype(jnp.float32), ((0, 0), (1, 1), (0, 0)))
    xcol = jnp.concatenate([xp[:, 0:L], xp[:, 1:L + 1], xp[:, 2:L + 2]], axis=-1)

    mask3 = mask.reshape(B, 1, L).astype(jnp.float32)
    rb = make_rel_bias(p['rel_bias_table'], L)                    # (H, L, L)
    row = lambda a: a.reshape(1, -1).astype(jnp.float32)
    bf = lambda a: a.astype(jnp.bfloat16)

    inputs = [xcol, mask3, w1_im2col, s1, w2_taps, s2, p['pe'],
              bf(p['wq'].T), bf(p['wk'].T), bf(p['wv'].T), rb,
              row(p['attn_ln_g']), row(p['attn_ln_b']),
              row(p['ln1_g']), row(p['ln1_b']),
              bf(p['ff_w1'].T), row(p['ff_b1']),
              bf(p['ff_w2'].T), row(p['ff_b2']),
              row(p['ln2_g']), row(p['ln2_b'])]
    in_specs = [
        pl.BlockSpec((None, L, 3 * Cin), lambda b: (b, 0, 0)),
        pl.BlockSpec((None, 1, L), lambda b: (b, 0, 0)),
        _const_spec((3 * Cin, E)), _const_spec((1, E)),
        _const_spec((3, E, E)), _const_spec((1, E)),
        _const_spec((L, E)),
        _const_spec((E, E)), _const_spec((E, E)), _const_spec((E, E)),
        _const_spec((H, L, L)),
        _const_spec((1, E)), _const_spec((1, E)),
        _const_spec((1, E)), _const_spec((1, E)),
        _const_spec((E, F)), _const_spec((1, F)),
        _const_spec((F, E)), _const_spec((1, E)),
        _const_spec((1, E)), _const_spec((1, E)),
    ]

    if role == 'inv':
        C = p['out_w'].shape[0]
        inputs += [bf(p['out_w'].T), p['out_b'].reshape(1, C).astype(jnp.float32)]
        in_specs += [_const_spec((E, C)), _const_spec((1, C))]
        out_shape = (jax.ShapeDtypeStruct((B, L, E), jnp.float32),
                     jax.ShapeDtypeStruct((B, 1, E), jnp.float32),
                     jax.ShapeDtypeStruct((B, 1, C), jnp.float32))
        out_specs = (pl.BlockSpec((None, L, E), lambda b: (b, 0, 0)),
                     pl.BlockSpec((None, 1, E), lambda b: (b, 0, 0)),
                     pl.BlockSpec((None, 1, C), lambda b: (b, 0, 0)))
        kern = functools.partial(fused_kernel_inv, num_heads=num_heads)
    else:  # 'dom'
        C = p['out1_w'].shape[0]
        Eh = E // 2
        w1h = jnp.zeros((E, C), jnp.float32).at[:Eh].set(p['out1_w'].T)
        w2h = jnp.zeros((E, C), jnp.float32).at[Eh:].set(p['out2_w'].T)
        inputs += [bf(w1h), p['out1_b'].reshape(1, C).astype(jnp.float32),
                   bf(w2h), p['out2_b'].reshape(1, C).astype(jnp.float32)]
        in_specs += [_const_spec((E, C)), _const_spec((1, C)),
                     _const_spec((E, C)), _const_spec((1, C))]
        out_shape = (jax.ShapeDtypeStruct((B, L, E), jnp.float32),
                     jax.ShapeDtypeStruct((B, 1, E), jnp.float32),
                     jax.ShapeDtypeStruct((B, 1, C), jnp.float32),
                     jax.ShapeDtypeStruct((B, 1, C), jnp.float32))
        out_specs = (pl.BlockSpec((None, L, E), lambda b: (b, 0, 0)),
                     pl.BlockSpec((None, 1, E), lambda b: (b, 0, 0)),
                     pl.BlockSpec((None, 1, C), lambda b: (b, 0, 0)),
                     pl.BlockSpec((None, 1, C), lambda b: (b, 0, 0)))
        kern = functools.partial(fused_kernel_dom, num_heads=num_heads)

    return pl.pallas_call(
        kern,
        out_shape=out_shape,
        grid=(B,),
        in_specs=in_specs,
        out_specs=out_specs,
        compiler_params=pltpu.CompilerParams(
            dimension_semantics=("parallel",)),   # one batch per TC on v7x
    )(*inputs)


# ----------------------------------------------------------------------------
# Small dense kernel (cross-role heads: dom_rev, classif)
# ----------------------------------------------------------------------------
def dense_kernel(x_ref, w_ref, b_ref, o_ref):
    o_ref[...] = (jnp.dot(x_ref[...], w_ref[...],
                          preferred_element_type=jnp.float32) + b_ref[...])


def dense(x, w, b):
    # x: (B, In);  w: torch (Out, In);  b: (Out,)
    B, In = x.shape
    Out = w.shape[0]
    return pl.pallas_call(
        dense_kernel,
        out_shape=jax.ShapeDtypeStruct((B, Out), jnp.float32),
        grid=(1,),
        in_specs=[pl.BlockSpec((B, In), lambda i: (0, 0)),
                  pl.BlockSpec((In, Out), lambda i: (0, 0)),
                  pl.BlockSpec((1, Out), lambda i: (0, 0))],
        out_specs=pl.BlockSpec((B, Out), lambda i: (0, 0)),
    )(x, w.T, b.reshape(1, Out))


# ----------------------------------------------------------------------------
# Parameter / buffer construction (deterministic, in-script)
# ----------------------------------------------------------------------------
def make_tape_pe(L, d_model):
    # tAPE with max_len = seq_len, scale_factor = 1 (Fix_pos_encode = 'Sin')
    position = jnp.arange(L, dtype=jnp.float32)[:, None]
    div_term = jnp.exp(jnp.arange(0, d_model, 2, dtype=jnp.float32)
                       * (-math.log(10000.0) / d_model))
    arg = position * div_term * (d_model / L)
    pe = jnp.zeros((L, d_model), jnp.float32)
    pe = pe.at[:, 0::2].set(jnp.sin(arg))
    pe = pe.at[:, 1::2].set(jnp.cos(arg))
    return pe


def make_rel_bias(table, L):
    # relative_index[i*L + j] = i - j + L - 1 ; gather + rearrange (glue)
    i = jnp.arange(L)[:, None]
    j = jnp.arange(L)[None, :]
    idx = i - j + (L - 1)
    rb = table[idx]                       # (L, L, H)
    return jnp.transpose(rb, (2, 0, 1))   # (H, L, L)


def init_casual_params(key, Cin, L, E, H, dim_ff, role, num_classes):
    ks = jax.random.split(key, 20)
    w = lambda k, shape, s=0.05: jax.random.normal(k, shape, jnp.float32) * s
    p = {}
    p['conv1_w'] = w(ks[0], (E, Cin, 3)); p['conv1_b'] = w(ks[1], (E,))
    p['bn1_g'] = 1.0 + w(ks[2], (E,));    p['bn1_b'] = w(ks[3], (E,))
    p['bn1_m'] = w(ks[4], (E,));          p['bn1_v'] = 1.0 + jnp.abs(w(ks[5], (E,)))
    p['conv2_w'] = w(ks[6], (E, E, 3));   p['conv2_b'] = w(ks[7], (E,))
    p['bn2_g'] = 1.0 + w(ks[8], (E,));    p['bn2_b'] = w(ks[9], (E,))
    p['bn2_m'] = w(ks[10], (E,));         p['bn2_v'] = 1.0 + jnp.abs(w(ks[11], (E,)))
    p['pe'] = make_tape_pe(L, E)
    p['wq'] = w(ks[12], (E, E)); p['wk'] = w(ks[13], (E, E)); p['wv'] = w(ks[14], (E, E))
    p['rel_bias_table'] = jnp.zeros((2 * L - 1, H), jnp.float32)   # torch.zeros init
    p['attn_ln_g'] = jnp.ones((E,), jnp.float32); p['attn_ln_b'] = jnp.zeros((E,), jnp.float32)
    p['ln1_g'] = jnp.ones((E,), jnp.float32);     p['ln1_b'] = jnp.zeros((E,), jnp.float32)
    p['ln2_g'] = jnp.ones((E,), jnp.float32);     p['ln2_b'] = jnp.zeros((E,), jnp.float32)
    p['ff_w1'] = w(ks[15], (dim_ff, E)); p['ff_b1'] = w(ks[16], (dim_ff,))
    p['ff_w2'] = w(ks[17], (E, dim_ff)); p['ff_b2'] = w(ks[18], (E,))
    if role == 'inv':
        k1, k2 = jax.random.split(ks[19])
        p['out_w'] = w(k1, (num_classes, E)); p['out_b'] = w(k2, (num_classes,))
    else:  # 'dom'
        k1, k2, k3, k4 = jax.random.split(ks[19], 4)
        p['out1_w'] = w(k1, (num_classes, E // 2)); p['out1_b'] = w(k2, (num_classes,))
        p['out2_w'] = w(k3, (num_classes, E // 2)); p['out2_b'] = w(k4, (num_classes,))
    return p


def init_params(key, Cin, L, emb_size, H, dim_ff, num_classes):
    k1, k2, k3, k4 = jax.random.split(key, 4)
    E_inv, E_dom = emb_size, emb_size * 2
    p = {'inv': init_casual_params(k1, Cin, L, E_inv, H, dim_ff, 'inv', num_classes),
         'spec': init_casual_params(k2, Cin, L, E_dom, H, dim_ff, 'dom', 8)}
    ka, kb = jax.random.split(k3)
    p['dom_rev_w'] = jax.random.normal(ka, (8, E_inv * L), jnp.float32) * 0.05
    p['dom_rev_b'] = jax.random.normal(kb, (8,), jnp.float32) * 0.05
    ka, kb = jax.random.split(k4)
    p['classif_w'] = jax.random.normal(ka, (num_classes, E_inv + E_dom // 2), jnp.float32) * 0.05
    p['classif_b'] = jax.random.normal(kb, (num_classes,), jnp.float32) * 0.05
    return p


# ----------------------------------------------------------------------------
# Forward pass (dropout layers are eval-mode identities)
# ----------------------------------------------------------------------------
def convtran_disentangle_forward(params, x, mask, num_heads, alpha=1.0):
    B = x.shape[0]
    # --- invariant branch (one fused kernel) ---------------------------------
    seq_inv, gap_inv3, logits_inv3 = casual_convtran_fused(
        params['inv'], x, mask, 'inv', num_heads)
    classif_inv = logits_inv3[:, 0, :]
    gap_inv = gap_inv3[:, 0, :]
    # nn.Flatten of (B, E, L): channel-major flatten of the sequence output.
    inv_emb = jnp.transpose(seq_inv, (0, 2, 1)).reshape(B, -1)
    # ReverseLayerF is a gradient-reversal layer — identity in the forward.
    adv_cl_dom = dense(inv_emb, params['dom_rev_w'], params['dom_rev_b'])

    # --- domain-specific branch (one fused kernel) ---------------------------
    seq_spec, gap_spec3, inf3, irr3 = casual_convtran_fused(
        params['spec'], x, mask, 'dom', num_heads)
    gap_spec = gap_spec3[:, 0, :]
    classif_spec_inf = inf3[:, 0, :]
    classif_spec_irr = irr3[:, 0, :]
    outa_spec = jnp.transpose(seq_spec, (0, 2, 1)).reshape(B, -1)
    half = outa_spec.shape[1] // 2
    spec_emb_inf = outa_spec[:, :half]
    spec_emb_irr = outa_spec[:, half:]

    # --- joint classifier -----------------------------------------------------
    classif_p1 = gap_inv
    classif_p2 = gap_spec[:, :gap_spec.shape[1] // 2]
    pred = dense(jnp.concatenate((classif_p1, classif_p2), axis=1),
                 params['classif_w'], params['classif_b'])
    return (classif_inv, inv_emb, spec_emb_inf, spec_emb_irr,
            classif_spec_inf, classif_spec_irr, adv_cl_dom, pred)


# ----------------------------------------------------------------------------
if __name__ == "__main__":
    B, L, Cin = 2, 16, 4          # Data_shape = (B, channel_size=4, seq_len=16)
    emb_size, num_heads, dim_ff, num_classes = 16, 8, 32, 11

    key = jax.random.PRNGKey(0)
    kx, kp = jax.random.split(key)
    x = jax.random.normal(kx, (B, L, Cin), jnp.float32)     # (B, seq_len, channels)
    mask = jnp.ones((B, L), jnp.float32).at[1, -3:].set(0.0)

    params = init_params(kp, Cin, L, emb_size, num_heads, dim_ff, num_classes)
    outs = convtran_disentangle_forward(params, x, mask, num_heads, alpha=1.0)
    outs = jax.block_until_ready(outs)

    expected = [(B, 11), (B, emb_size * L), (B, 2 * emb_size * L // 2),
                (B, 2 * emb_size * L // 2), (B, 8), (B, 8), (B, 8), (B, 11)]
    assert [tuple(o.shape) for o in outs] == expected, \
        [tuple(o.shape) for o in outs]
    print("KERNEL_OK")
</pallas_src>

<mosaic_0001>
module attributes {stable_mosaic.version = 11 : i64} {
  func.func @fused_kernel_inv(%arg0: i32, %arg1: memref<1x16x12xf32, #tpu.memory_space<vmem>>, %arg2: memref<1x1x16xf32, #tpu.memory_space<vmem>>, %arg3: memref<12x16xbf16, #tpu.memory_space<vmem>>, %arg4: memref<1x16xf32, #tpu.memory_space<vmem>>, %arg5: memref<3x16x16xbf16, #tpu.memory_space<vmem>>, %arg6: memref<1x16xf32, #tpu.memory_space<vmem>>, %arg7: memref<16x16xf32, #tpu.memory_space<vmem>>, %arg8: memref<16x16xbf16, #tpu.memory_space<vmem>>, %arg9: memref<16x16xbf16, #tpu.memory_space<vmem>>, %arg10: memref<16x16xbf16, #tpu.memory_space<vmem>>, %arg11: memref<8x16x16xf32, #tpu.memory_space<vmem>>, %arg12: memref<1x16xf32, #tpu.memory_space<vmem>>, %arg13: memref<1x16xf32, #tpu.memory_space<vmem>>, %arg14: memref<1x16xf32, #tpu.memory_space<vmem>>, %arg15: memref<1x16xf32, #tpu.memory_space<vmem>>, %arg16: memref<16x32xbf16, #tpu.memory_space<vmem>>, %arg17: memref<1x32xf32, #tpu.memory_space<vmem>>, %arg18: memref<32x16xbf16, #tpu.memory_space<vmem>>, %arg19: memref<1x16xf32, #tpu.memory_space<vmem>>, %arg20: memref<1x16xf32, #tpu.memory_space<vmem>>, %arg21: memref<1x16xf32, #tpu.memory_space<vmem>>, %arg22: memref<16x11xbf16, #tpu.memory_space<vmem>>, %arg23: memref<1x11xf32, #tpu.memory_space<vmem>>, %arg24: memref<1x16x16xf32, #tpu.memory_space<vmem>>, %arg25: memref<1x1x16xf32, #tpu.memory_space<vmem>>, %arg26: memref<1x1x11xf32, #tpu.memory_space<vmem>>) attributes {dimension_semantics = [#tpu.dimension_semantics<parallel>], iteration_bounds = array<i64: 2>, scalar_prefetch = 0 : i64, scratch_operands = 0 : i64, tpu.core_type = #tpu.core_type<tc>, window_params = [{transform_indices = @transform_0, window_bounds = array<i64: 1, 16, 12>}, {transform_indices = @transform_1, window_bounds = array<i64: 1, 1, 16>}, {pipeline_mode = #tpu.pipeline_mode<synchronous>, transform_indices = @transform_2, window_bounds = array<i64: 12, 16>}, {pipeline_mode = #tpu.pipeline_mode<synchronous>, transform_indices = @transform_3, window_bounds = array<i64: 1, 16>}, {pipeline_mode = #tpu.pipeline_mode<synchronous>, transform_indices = @transform_4, window_bounds = array<i64: 3, 16, 16>}, {pipeline_mode = #tpu.pipeline_mode<synchronous>, transform_indices = @transform_5, window_bounds = array<i64: 1, 16>}, {pipeline_mode = #tpu.pipeline_mode<synchronous>, transform_indices = @transform_6, window_bounds = array<i64: 16, 16>}, {pipeline_mode = #tpu.pipeline_mode<synchronous>, transform_indices = @transform_7, window_bounds = array<i64: 16, 16>}, {pipeline_mode = #tpu.pipeline_mode<synchronous>, transform_indices = @transform_8, window_bounds = array<i64: 16, 16>}, {pipeline_mode = #tpu.pipeline_mode<synchronous>, transform_indices = @transform_9, window_bounds = array<i64: 16, 16>}, {pipeline_mode = #tpu.pipeline_mode<synchronous>, transform_indices = @transform_10, window_bounds = array<i64: 8, 16, 16>}, {pipeline_mode = #tpu.pipeline_mode<synchronous>, transform_indices = @transform_11, window_bounds = array<i64: 1, 16>}, {pipeline_mode = #tpu.pipeline_mode<synchronous>, transform_indices = @transform_12, window_bounds = array<i64: 1, 16>}, {pipeline_mode = #tpu.pipeline_mode<synchronous>, transform_indices = @transform_13, window_bounds = array<i64: 1, 16>}, {pipeline_mode = #tpu.pipeline_mode<synchronous>, transform_indices = @transform_14, window_bounds = array<i64: 1, 16>}, {pipeline_mode = #tpu.pipeline_mode<synchronous>, transform_indices = @transform_15, window_bounds = array<i64: 16, 32>}, {pipeline_mode = #tpu.pipeline_mode<synchronous>, transform_indices = @transform_16, window_bounds = array<i64: 1, 32>}, {pipeline_mode = #tpu.pipeline_mode<synchronous>, transform_indices = @transform_17, window_bounds = array<i64: 32, 16>}, {pipeline_mode = #tpu.pipeline_mode<synchronous>, transform_indices = @transform_18, window_bounds = array<i64: 1, 16>}, {pipeline_mode = #tpu.pipeline_mode<synchronous>, transform_indices = @transform_19, window_bounds = array<i64: 1, 16>}, {pipeline_mode = #tpu.pipeline_mode<synchronous>, transform_indices = @transform_20, window_bounds = array<i64: 1, 16>}, {pipeline_mode = #tpu.pipeline_mode<synchronous>, transform_indices = @transform_21, window_bounds = array<i64: 16, 11>}, {pipeline_mode = #tpu.pipeline_mode<synchronous>, transform_indices = @transform_22, window_bounds = array<i64: 1, 11>}, {transform_indices = @transform_23, window_bounds = array<i64: 1, 16, 16>}, {transform_indices = @transform_24, window_bounds = array<i64: 1, 1, 16>}, {transform_indices = @transform_25, window_bounds = array<i64: 1, 1, 11>}]} {
    %c0 = arith.constant 0 : index
    %c0_0 = arith.constant 0 : index
    %c0_1 = arith.constant 0 : index
    %0 = vector.load %arg1[%c0, %c0_0, %c0_1] : memref<1x16x12xf32, #tpu.memory_space<vmem>>, vector<1x16x12xf32>
    %1 = vector.shape_cast %0 : vector<1x16x12xf32> to vector<16x12xf32>
    %c0_2 = arith.constant 0 : index
    %c0_3 = arith.constant 0 : index
    %2 = vector.load %arg3[%c0_2, %c0_3] : memref<12x16xbf16, #tpu.memory_space<vmem>>, vector<12x16xbf16>
    %3 = arith.truncf %1 : vector<16x12xf32> to vector<16x12xbf16>
    %cst = arith.constant dense<0.000000e+00> : vector<16x16xf32>
    %4 = tpu.matmul %3, %2, %cst {dimension_numbers = #tpu.dot_dimension_numbers<[1], [0], [0], [1], [0, 0, 1, 1], [], []>} : vector<16x12xbf16>, vector<12x16xbf16>, vector<16x16xf32> -> vector<16x16xf32>
    %c0_4 = arith.constant 0 : index
    %c0_5 = arith.constant 0 : index
    %5 = vector.load %arg4[%c0_4, %c0_5] : memref<1x16xf32, #tpu.memory_space<vmem>>, vector<1x16xf32>
    %6 = vector.broadcast %5 : vector<1x16xf32> to vector<16x16xf32>
    %7 = arith.addf %4, %6 : vector<16x16xf32>
    %8 = arith.mulf %7, %7 : vector<16x16xf32>
    %9 = arith.mulf %7, %8 : vector<16x16xf32>
    %cst_6 = arith.constant 4.471500e-02 : f32
    %10 = vector.broadcast %cst_6 : f32 to vector<16x16xf32>
    %11 = arith.mulf %10, %9 : vector<16x16xf32>
    %12 = arith.addf %7, %11 : vector<16x16xf32>
    %cst_7 = arith.constant 0.797884583 : f32
    %13 = vector.broadcast %cst_7 : f32 to vector<16x16xf32>
    %14 = arith.mulf %13, %12 : vector<16x16xf32>
    %15 = math.tanh %14 : vector<16x16xf32>
    %cst_8 = arith.constant 1.000000e+00 : f32
    %16 = vector.broadcast %cst_8 : f32 to vector<16x16xf32>
    %17 = arith.addf %16, %15 : vector<16x16xf32>
    %cst_9 = arith.constant 5.000000e-01 : f32
    %18 = vector.broadcast %cst_9 : f32 to vector<16x16xf32>
    %19 = arith.mulf %18, %17 : vector<16x16xf32>
    %20 = arith.mulf %7, %19 : vector<16x16xf32>
    %21 = tpu.iota {dimensions = array<i32: 0>} : vector<16x16xi32>
    %22 = tpu.iota {dimensions = array<i32: 1>} : vector<16x16xi32>
    %c1_i32 = arith.constant 1 : i32
    %23 = vector.broadcast %c1_i32 : i32 to vector<16x16xi32>
    %24 = arith.addi %22, %23 : vector<16x16xi32>
    %25 = arith.cmpi eq, %21, %24 : vector<16x16xi32>
    %26 = arith.extui %25 : vector<16x16xi1> to vector<16x16xi32>
    %27 = arith.sitofp %26 : vector<16x16xi32> to vector<16x16xf32>
    %28 = arith.truncf %27 : vector<16x16xf32> to vector<16x16xbf16>
    %c1_i32_10 = arith.constant 1 : i32
    %29 = vector.broadcast %c1_i32_10 : i32 to vector<16x16xi32>
    %30 = arith.addi %21, %29 : vector<16x16xi32>
    %31 = arith.cmpi eq, %30, %22 : vector<16x16xi32>
    %32 = arith.extui %31 : vector<16x16xi1> to vector<16x16xi32>
    %33 = arith.sitofp %32 : vector<16x16xi32> to vector<16x16xf32>
    %34 = arith.truncf %33 : vector<16x16xf32> to vector<16x16xbf16>
    %35 = arith.truncf %20 : vector<16x16xf32> to vector<16x16xbf16>
    %cst_11 = arith.constant dense<0.000000e+00> : vector<16x16xf32>
    %36 = tpu.matmul %28, %35, %cst_11 {dimension_numbers = #tpu.dot_dimension_numbers<[1], [0], [0], [1], [0, 0, 1, 1], [], []>} : vector<16x16xbf16>, vector<16x16xbf16>, vector<16x16xf32> -> vector<16x16xf32>
    %cst_12 = arith.constant dense<0.000000e+00> : vector<16x16xf32>
    %37 = tpu.matmul %34, %35, %cst_12 {dimension_numbers = #tpu.dot_dimension_numbers<[1], [0], [0], [1], [0, 0, 1, 1], [], []>} : vector<16x16xbf16>, vector<16x16xbf16>, vector<16x16xf32> -> vector<16x16xf32>
    %c0_13 = arith.constant 0 : index
    %c0_14 = arith.constant 0 : index
    %c0_15 = arith.constant 0 : index
    %38 = vector.load %arg5[%c0_13, %c0_14, %c0_15] : memref<3x16x16xbf16, #tpu.memory_space<vmem>>, vector<1x16x16xbf16>
    %39 = vector.shape_cast %38 : vector<1x16x16xbf16> to vector<16x16xbf16>
    %40 = arith.truncf %36 : vector<16x16xf32> to vector<16x16xbf16>
    %cst_16 = arith.constant dense<0.000000e+00> : vector<16x16xf32>
    %41 = tpu.matmul %40, %39, %cst_16 {dimension_numbers = #tpu.dot_dimension_numbers<[1], [0], [0], [1], [0, 0, 1, 1], [], []>} : vector<16x16xbf16>, vector<16x16xbf16>, vector<16x16xf32> -> vector<16x16xf32>
    %c1 = arith.constant 1 : index
    %c0_17 = arith.constant 0 : index
    %c0_18 = arith.constant 0 : index
    %42 = vector.load %arg5[%c1, %c0_17, %c0_18] : memref<3x16x16xbf16, #tpu.memory_space<vmem>>, vector<1x16x16xbf16>
    %43 = vector.shape_cast %42 : vector<1x16x16xbf16> to vector<16x16xbf16>
    %cst_19 = arith.constant dense<0.000000e+00> : vector<16x16xf32>
    %44 = tpu.matmul %35, %43, %cst_19 {dimension_numbers = #tpu.dot_dimension_numbers<[1], [0], [0], [1], [0, 0, 1, 1], [], []>} : vector<16x16xbf16>, vector<16x16xbf16>, vector<16x16xf32> -> vector<16x16xf32>
    %45 = arith.addf %41, %44 : vector<16x16xf32>
    %c2 = arith.constant 2 : index
    %c0_20 = arith.constant 0 : index
    %c0_21 = arith.constant 0 : index
    %46 = vector.load %arg5[%c2, %c0_20, %c0_21] : memref<3x16x16xbf16, #tpu.memory_space<vmem>>, vector<1x16x16xbf16>
    %47 = vector.shape_cast %46 : vector<1x16x16xbf16> to vector<16x16xbf16>
    %48 = arith.truncf %37 : vector<16x16xf32> to vector<16x16xbf16>
    %cst_22 = arith.constant dense<0.000000e+00> : vector<16x16xf32>
    %49 = tpu.matmul %48, %47, %cst_22 {dimension_numbers = #tpu.dot_dimension_numbers<[1], [0], [0], [1], [0, 0, 1, 1], [], []>} : vector<16x16xbf16>, vector<16x16xbf16>, vector<16x16xf32> -> vector<16x16xf32>
    %50 = arith.addf %45, %49 : vector<16x16xf32>
    %c0_23 = arith.constant 0 : index
    %c0_24 = arith.constant 0 : index
    %51 = vector.load %arg6[%c0_23, %c0_24] : memref<1x16xf32, #tpu.memory_space<vmem>>, vector<1x16xf32>
    %52 = vector.broadcast %51 : vector<1x16xf32> to vector<16x16xf32>
    %53 = arith.addf %50, %52 : vector<16x16xf32>
    %54 = arith.mulf %53, %53 : vector<16x16xf32>
    %55 = arith.mulf %53, %54 : vector<16x16xf32>
    %cst_25 = arith.constant 4.471500e-02 : f32
    %56 = vector.broadcast %cst_25 : f32 to vector<16x16xf32>
    %57 = arith.mulf %56, %55 : vector<16x16xf32>
    %58 = arith.addf %53, %57 : vector<16x16xf32>
    %cst_26 = arith.constant 0.797884583 : f32
    %59 = vector.broadcast %cst_26 : f32 to vector<16x16xf32>
    %60 = arith.mulf %59, %58 : vector<16x16xf32>
    %61 = math.tanh %60 : vector<16x16xf32>
    %cst_27 = arith.constant 1.000000e+00 : f32
    %62 = vector.broadcast %cst_27 : f32 to vector<16x16xf32>
    %63 = arith.addf %62, %61 : vector<16x16xf32>
    %cst_28 = arith.constant 5.000000e-01 : f32
    %64 = vector.broadcast %cst_28 : f32 to vector<16x16xf32>
    %65 = arith.mulf %64, %63 : vector<16x16xf32>
    %66 = arith.mulf %53, %65 : vector<16x16xf32>
    %c0_29 = arith.constant 0 : index
    %c0_30 = arith.constant 0 : index
    %67 = vector.load %arg7[%c0_29, %c0_30] : memref<16x16xf32, #tpu.memory_space<vmem>>, vector<16x16xf32>
    %68 = arith.addf %66, %67 : vector<16x16xf32>
    %69 = arith.truncf %68 : vector<16x16xf32> to vector<16x16xbf16>
    %c0_31 = arith.constant 0 : index
    %c0_32 = arith.constant 0 : index
    %70 = vector.load %arg8[%c0_31, %c0_32] : memref<16x16xbf16, #tpu.memory_space<vmem>>, vector<16x16xbf16>
    %cst_33 = arith.constant dense<0.000000e+00> : vector<16x16xf32>
    %71 = tpu.matmul %69, %70, %cst_33 {dimension_numbers = #tpu.dot_dimension_numbers<[1], [0], [0], [1], [0, 0, 1, 1], [], []>} : vector<16x16xbf16>, vector<16x16xbf16>, vector<16x16xf32> -> vector<16x16xf32>
    %c0_34 = arith.constant 0 : index
    %c0_35 = arith.constant 0 : index
    %72 = vector.load %arg9[%c0_34, %c0_35] : memref<16x16xbf16, #tpu.memory_space<vmem>>, vector<16x16xbf16>
    %cst_36 = arith.constant dense<0.000000e+00> : vector<16x16xf32>
    %73 = tpu.matmul %69, %72, %cst_36 {dimension_numbers = #tpu.dot_dimension_numbers<[1], [0], [0], [1], [0, 0, 1, 1], [], []>} : vector<16x16xbf16>, vector<16x16xbf16>, vector<16x16xf32> -> vector<16x16xf32>
    %c0_37 = arith.constant 0 : index
    %c0_38 = arith.constant 0 : index
    %74 = vector.load %arg10[%c0_37, %c0_38] : memref<16x16xbf16, #tpu.memory_space<vmem>>, vector<16x16xbf16>
    %cst_39 = arith.constant dense<0.000000e+00> : vector<16x16xf32>
    %75 = tpu.matmul %69, %74, %cst_39 {dimension_numbers = #tpu.dot_dimension_numbers<[1], [0], [0], [1], [0, 0, 1, 1], [], []>} : vector<16x16xbf16>, vector<16x16xbf16>, vector<16x16xf32> -> vector<16x16xf32>
    %c0_40 = arith.constant 0 : index
    %c0_41 = arith.constant 0 : index
    %c0_42 = arith.constant 0 : index
    %76 = vector.load %arg2[%c0_40, %c0_41, %c0_42] : memref<1x1x16xf32, #tpu.memory_space<vmem>>, vector<1x1x16xf32>
    %77 = vector.shape_cast %76 : vector<1x1x16xf32> to vector<1x16xf32>
    %cst_43 = arith.constant 0.000000e+00 : f32
    %78 = vector.broadcast %cst_43 : f32 to vector<1x16xf32>
    %79 = arith.cmpf oeq, %77, %78 : vector<1x16xf32>
    %80 = tpu.iota {dimensions = array<i32: 1>} : vector<1x16xi32>
    %cst_44 = arith.constant 0.000000e+00 : f32
    %81 = vector.broadcast %cst_44 : f32 to vector<16x16xf32>
    %c0_i32 = arith.constant 0 : i32
    %82 = vector.broadcast %c0_i32 : i32 to vector<1x16xi32>
    %83 = arith.cmpi sge, %80, %82 : vector<1x16xi32>
    %c2_i32 = arith.constant 2 : i32
    %84 = vector.broadcast %c2_i32 : i32 to vector<1x16xi32>
    %85 = arith.cmpi slt, %80, %84 : vector<1x16xi32>
    %86 = arith.andi %83, %85 : vector<1x16xi1>
    %87 = arith.extui %86 : vector<1x16xi1> to vector<1x16xi32>
    %88 = arith.sitofp %87 : vector<1x16xi32> to vector<1x16xf32>
    %89 = vector.broadcast %88 : vector<1x16xf32> to vector<16x16xf32>
    %90 = arith.mulf %71, %89 : vector<16x16xf32>
    %cst_45 = arith.constant dense<0.000000e+00> : vector<16x16xf32>
    %91 = tpu.matmul %90, %73, %cst_45 {dimension_numbers = #tpu.dot_dimension_numbers<[1], [1], [0], [0], [0, 0, 1, 0], [], []>} : vector<16x16xf32>, vector<16x16xf32>, vector<16x16xf32> -> vector<16x16xf32>
    %cst_46 = arith.constant 2.500000e-01 : f32
    %92 = vector.broadcast %cst_46 : f32 to vector<16x16xf32>
    %93 = arith.mulf %91, %92 : vector<16x16xf32>
    %cst_47 = arith.constant -1.000000e+04 : f32
    %94 = vector.shape_cast %79 : vector<1x16xi1> to vector<1x16xi1>
    %95 = vector.broadcast %94 : vector<1x16xi1> to vector<16x16xi1>
    %96 = vector.broadcast %cst_47 : f32 to vector<16x16xf32>
    %97 = arith.select %95, %96, %93 : vector<16x16xi1>, vector<16x16xf32>
    %cst_48 = arith.constant dense<0xFF800000> : vector<16xf32>
    %98 = vector.multi_reduction <maximumf>, %97, %cst_48 [1] : vector<16x16xf32> to vector<16xf32>
    %99 = vector.shape_cast %98 : vector<16xf32> to vector<16x1xf32>
    %100 = vector.broadcast %99 : vector<16x1xf32> to vector<16x16xf32>
    %101 = arith.subf %97, %100 : vector<16x16xf32>
    %102 = math.exp %101 : vector<16x16xf32>
    %cst_49 = arith.constant dense<0.000000e+00> : vector<16xf32>
    %103 = vector.multi_reduction <add>, %102, %cst_49 [1] : vector<16x16xf32> to vector<16xf32>
    %104 = vector.shape_cast %103 : vector<16xf32> to vector<16x1xf32>
    %105 = vector.broadcast %104 : vector<16x1xf32> to vector<16x16xf32>
    %106 = arith.divf %102, %105 : vector<16x16xf32>
    %c0_50 = arith.constant 0 : index
    %c0_51 = arith.constant 0 : index
    %c0_52 = arith.constant 0 : index
    %107 = vector.load %arg11[%c0_50, %c0_51, %c0_52] : memref<8x16x16xf32, #tpu.memory_space<vmem>>, vector<1x16x16xf32>
    %108 = vector.shape_cast %107 : vector<1x16x16xf32> to vector<16x16xf32>
    %109 = arith.addf %106, %108 : vector<16x16xf32>
    %110 = vector.broadcast %88 : vector<1x16xf32> to vector<16x16xf32>
    %111 = arith.mulf %75, %110 : vector<16x16xf32>
    %cst_53 = arith.constant dense<0.000000e+00> : vector<16x16xf32>
    %112 = tpu.matmul %109, %111, %cst_53 {dimension_numbers = #tpu.dot_dimension_numbers<[1], [0], [0], [1], [0, 0, 1, 1], [], []>} : vector<16x16xf32>, vector<16x16xf32>, vector<16x16xf32> -> vector<16x16xf32>
    %113 = arith.addf %81, %112 : vector<16x16xf32>
    %c2_i32_54 = arith.constant 2 : i32
    %114 = vector.broadcast %c2_i32_54 : i32 to vector<1x16xi32>
    %115 = arith.cmpi sge, %80, %114 : vector<1x16xi32>
    %c4_i32 = arith.constant 4 : i32
    %116 = vector.broadcast %c4_i32 : i32 to vector<1x16xi32>
    %117 = arith.cmpi slt, %80, %116 : vector<1x16xi32>
    %118 = arith.andi %115, %117 : vector<1x16xi1>
    %119 = arith.extui %118 : vector<1x16xi1> to vector<1x16xi32>
    %120 = arith.sitofp %119 : vector<1x16xi32> to vector<1x16xf32>
    %121 = vector.broadcast %120 : vector<1x16xf32> to vector<16x16xf32>
    %122 = arith.mulf %71, %121 : vector<16x16xf32>
    %cst_55 = arith.constant dense<0.000000e+00> : vector<16x16xf32>
    %123 = tpu.matmul %122, %73, %cst_55 {dimension_numbers = #tpu.dot_dimension_numbers<[1], [1], [0], [0], [0, 0, 1, 0], [], []>} : vector<16x16xf32>, vector<16x16xf32>, vector<16x16xf32> -> vector<16x16xf32>
    %cst_56 = arith.constant 2.500000e-01 : f32
    %124 = vector.broadcast %cst_56 : f32 to vector<16x16xf32>
    %125 = arith.mulf %123, %124 : vector<16x16xf32>
    %cst_57 = arith.constant -1.000000e+04 : f32
    %126 = vector.shape_cast %79 : vector<1x16xi1> to vector<1x16xi1>
    %127 = vector.broadcast %126 : vector<1x16xi1> to vector<16x16xi1>
    %128 = vector.broadcast %cst_57 : f32 to vector<16x16xf32>
    %129 = arith.select %127, %128, %125 : vector<16x16xi1>, vector<16x16xf32>
    %cst_58 = arith.constant dense<0xFF800000> : vector<16xf32>
    %130 = vector.multi_reduction <maximumf>, %129, %cst_58 [1] : vector<16x16xf32> to vector<16xf32>
    %131 = vector.shape_cast %130 : vector<16xf32> to vector<16x1xf32>
    %132 = vector.broadcast %131 : vector<16x1xf32> to vector<16x16xf32>
    %133 = arith.subf %129, %132 : vector<16x16xf32>
    %134 = math.exp %133 : vector<16x16xf32>
    %cst_59 = arith.constant dense<0.000000e+00> : vector<16xf32>
    %135 = vector.multi_reduction <add>, %134, %cst_59 [1] : vector<16x16xf32> to vector<16xf32>
    %136 = vector.shape_cast %135 : vector<16xf32> to vector<16x1xf32>
    %137 = vector.broadcast %136 : vector<16x1xf32> to vector<16x16xf32>
    %138 = arith.divf %134, %137 : vector<16x16xf32>
    %c1_60 = arith.constant 1 : index
    %c0_61 = arith.constant 0 : index
    %c0_62 = arith.constant 0 : index
    %139 = vector.load %arg11[%c1_60, %c0_61, %c0_62] : memref<8x16x16xf32, #tpu.memory_space<vmem>>, vector<1x16x16xf32>
    %140 = vector.shape_cast %139 : vector<1x16x16xf32> to vector<16x16xf32>
    %141 = arith.addf %138, %140 : vector<16x16xf32>
    %142 = vector.broadcast %120 : vector<1x16xf32> to vector<16x16xf32>
    %143 = arith.mulf %75, %142 : vector<16x16xf32>
    %cst_63 = arith.constant dense<0.000000e+00> : vector<16x16xf32>
    %144 = tpu.matmul %141, %143, %cst_63 {dimension_numbers = #tpu.dot_dimension_numbers<[1], [0], [0], [1], [0, 0, 1, 1], [], []>} : vector<16x16xf32>, vector<16x16xf32>, vector<16x16xf32> -> vector<16x16xf32>
    %145 = arith.addf %113, %144 : vector<16x16xf32>
    %c4_i32_64 = arith.constant 4 : i32
    %146 = vector.broadcast %c4_i32_64 : i32 to vector<1x16xi32>
    %147 = arith.cmpi sge, %80, %146 : vector<1x16xi32>
    %c6_i32 = arith.constant 6 : i32
    %148 = vector.broadcast %c6_i32 : i32 to vector<1x16xi32>
    %149 = arith.cmpi slt, %80, %148 : vector<1x16xi32>
    %150 = arith.andi %147, %149 : vector<1x16xi1>
    %151 = arith.extui %150 : vector<1x16xi1> to vector<1x16xi32>
    %152 = arith.sitofp %151 : vector<1x16xi32> to vector<1x16xf32>
    %153 = vector.broadcast %152 : vector<1x16xf32> to vector<16x16xf32>
    %154 = arith.mulf %71, %153 : vector<16x16xf32>
    %cst_65 = arith.constant dense<0.000000e+00> : vector<16x16xf32>
    %155 = tpu.matmul %154, %73, %cst_65 {dimension_numbers = #tpu.dot_dimension_numbers<[1], [1], [0], [0], [0, 0, 1, 0], [], []>} : vector<16x16xf32>, vector<16x16xf32>, vector<16x16xf32> -> vector<16x16xf32>
    %cst_66 = arith.constant 2.500000e-01 : f32
    %156 = vector.broadcast %cst_66 : f32 to vector<16x16xf32>
    %157 = arith.mulf %155, %156 : vector<16x16xf32>
    %cst_67 = arith.constant -1.000000e+04 : f32
    %158 = vector.shape_cast %79 : vector<1x16xi1> to vector<1x16xi1>
    %159 = vector.broadcast %158 : vector<1x16xi1> to vector<16x16xi1>
    %160 = vector.broadcast %cst_67 : f32 to vector<16x16xf32>
    %161 = arith.select %159, %160, %157 : vector<16x16xi1>, vector<16x16xf32>
    %cst_68 = arith.constant dense<0xFF800000> : vector<16xf32>
    %162 = vector.multi_reduction <maximumf>, %161, %cst_68 [1] : vector<16x16xf32> to vector<16xf32>
    %163 = vector.shape_cast %162 : vector<16xf32> to vector<16x1xf32>
    %164 = vector.broadcast %163 : vector<16x1xf32> to vector<16x16xf32>
    %165 = arith.subf %161, %164 : vector<16x16xf32>
    %166 = math.exp %165 : vector<16x16xf32>
    %cst_69 = arith.constant dense<0.000000e+00> : vector<16xf32>
    %167 = vector.multi_reduction <add>, %166, %cst_69 [1] : vector<16x16xf32> to vector<16xf32>
    %168 = vector.shape_cast %167 : vector<16xf32> to vector<16x1xf32>
    %169 = vector.broadcast %168 : vector<16x1xf32> to vector<16x16xf32>
    %170 = arith.divf %166, %169 : vector<16x16xf32>
    %c2_70 = arith.constant 2 : index
    %c0_71 = arith.constant 0 : index
    %c0_72 = arith.constant 0 : index
    %171 = vector.load %arg11[%c2_70, %c0_71, %c0_72] : memref<8x16x16xf32, #tpu.memory_space<vmem>>, vector<1x16x16xf32>
    %172 = vector.shape_cast %171 : vector<1x16x16xf32> to vector<16x16xf32>
    %173 = arith.addf %170, %172 : vector<16x16xf32>
    %174 = vector.broadcast %152 : vector<1x16xf32> to vector<16x16xf32>
    %175 = arith.mulf %75, %174 : vector<16x16xf32>
    %cst_73 = arith.constant dense<0.000000e+00> : vector<16x16xf32>
    %176 = tpu.matmul %173, %175, %cst_73 {dimension_numbers = #tpu.dot_dimension_numbers<[1], [0], [0], [1], [0, 0, 1, 1], [], []>} : vector<16x16xf32>, vector<16x16xf32>, vector<16x16xf32> -> vector<16x16xf32>
    %177 = arith.addf %145, %176 : vector<16x16xf32>
    %c6_i32_74 = arith.constant 6 : i32
    %178 = vector.broadcast %c6_i32_74 : i32 to vector<1x16xi32>
    %179 = arith.cmpi sge, %80, %178 : vector<1x16xi32>
    %c8_i32 = arith.constant 8 : i32
    %180 = vector.broadcast %c8_i32 : i32 to vector<1x16xi32>
    %181 = arith.cmpi slt, %80, %180 : vector<1x16xi32>
    %182 = arith.andi %179, %181 : vector<1x16xi1>
    %183 = arith.extui %182 : vector<1x16xi1> to vector<1x16xi32>
    %184 = arith.sitofp %183 : vector<1x16xi32> to vector<1x16xf32>
    %185 = vector.broadcast %184 : vector<1x16xf32> to vector<16x16xf32>
    %186 = arith.mulf %71, %185 : vector<16x16xf32>
    %cst_75 = arith.constant dense<0.000000e+00> : vector<16x16xf32>
    %187 = tpu.matmul %186, %73, %cst_75 {dimension_numbers = #tpu.dot_dimension_numbers<[1], [1], [0], [0], [0, 0, 1, 0], [], []>} : vector<16x16xf32>, vector<16x16xf32>, vector<16x16xf32> -> vector<16x16xf32>
    %cst_76 = arith.constant 2.500000e-01 : f32
    %188 = vector.broadcast %cst_76 : f32 to vector<16x16xf32>
    %189 = arith.mulf %187, %188 : vector<16x16xf32>
    %cst_77 = arith.constant -1.000000e+04 : f32
    %190 = vector.shape_cast %79 : vector<1x16xi1> to vector<1x16xi1>
    %191 = vector.broadcast %190 : vector<1x16xi1> to vector<16x16xi1>
    %192 = vector.broadcast %cst_77 : f32 to vector<16x16xf32>
    %193 = arith.select %191, %192, %189 : vector<16x16xi1>, vector<16x16xf32>
    %cst_78 = arith.constant dense<0xFF800000> : vector<16xf32>
    %194 = vector.multi_reduction <maximumf>, %193, %cst_78 [1] : vector<16x16xf32> to vector<16xf32>
    %195 = vector.shape_cast %194 : vector<16xf32> to vector<16x1xf32>
    %196 = vector.broadcast %195 : vector<16x1xf32> to vector<16x16xf32>
    %197 = arith.subf %193, %196 : vector<16x16xf32>
    %198 = math.exp %197 : vector<16x16xf32>
    %cst_79 = arith.constant dense<0.000000e+00> : vector<16xf32>
    %199 = vector.multi_reduction <add>, %198, %cst_79 [1] : vector<16x16xf32> to vector<16xf32>
    %200 = vector.shape_cast %199 : vector<16xf32> to vector<16x1xf32>
    %201 = vector.broadcast %200 : vector<16x1xf32> to vector<16x16xf32>
    %202 = arith.divf %198, %201 : vector<16x16xf32>
    %c3 = arith.constant 3 : index
    %c0_80 = arith.constant 0 : index
    %c0_81 = arith.constant 0 : index
    %203 = vector.load %arg11[%c3, %c0_80, %c0_81] : memref<8x16x16xf32, #tpu.memory_space<vmem>>, vector<1x16x16xf32>
    %204 = vector.shape_cast %203 : vector<1x16x16xf32> to vector<16x16xf32>
    %205 = arith.addf %202, %204 : vector<16x16xf32>
    %206 = vector.broadcast %184 : vector<1x16xf32> to vector<16x16xf32>
    %207 = arith.mulf %75, %206 : vector<16x16xf32>
    %cst_82 = arith.constant dense<0.000000e+00> : vector<16x16xf32>
    %208 = tpu.matmul %205, %207, %cst_82 {dimension_numbers = #tpu.dot_dimension_numbers<[1], [0], [0], [1], [0, 0, 1, 1], [], []>} : vector<16x16xf32>, vector<16x16xf32>, vector<16x16xf32> -> vector<16x16xf32>
    %209 = arith.addf %177, %208 : vector<16x16xf32>
    %c8_i32_83 = arith.constant 8 : i32
    %210 = vector.broadcast %c8_i32_83 : i32 to vector<1x16xi32>
    %211 = arith.cmpi sge, %80, %210 : vector<1x16xi32>
    %c10_i32 = arith.constant 10 : i32
    %212 = vector.broadcast %c10_i32 : i32 to vector<1x16xi32>
    %213 = arith.cmpi slt, %80, %212 : vector<1x16xi32>
    %214 = arith.andi %211, %213 : vector<1x16xi1>
    %215 = arith.extui %214 : vector<1x16xi1> to vector<1x16xi32>
    %216 = arith.sitofp %215 : vector<1x16xi32> to vector<1x16xf32>
    %217 = vector.broadcast %216 : vector<1x16xf32> to vector<16x16xf32>
    %218 = arith.mulf %71, %217 : vector<16x16xf32>
    %cst_84 = arith.constant dense<0.000000e+00> : vector<16x16xf32>
    %219 = tpu.matmul %218, %73, %cst_84 {dimension_numbers = #tpu.dot_dimension_numbers<[1], [1], [0], [0], [0, 0, 1, 0], [], []>} : vector<16x16xf32>, vector<16x16xf32>, vector<16x16xf32> -> vector<16x16xf32>
    %cst_85 = arith.constant 2.500000e-01 : f32
    %220 = vector.broadcast %cst_85 : f32 to vector<16x16xf32>
    %221 = arith.mulf %219, %220 : vector<16x16xf32>
    %cst_86 = arith.constant -1.000000e+04 : f32
    %222 = vector.shape_cast %79 : vector<1x16xi1> to vector<1x16xi1>
    %223 = vector.broadcast %222 : vector<1x16xi1> to vector<16x16xi1>
    %224 = vector.broadcast %cst_86 : f32 to vector<16x16xf32>
    %225 = arith.select %223, %224, %221 : vector<16x16xi1>, vector<16x16xf32>
    %cst_87 = arith.constant dense<0xFF800000> : vector<16xf32>
    %226 = vector.multi_reduction <maximumf>, %225, %cst_87 [1] : vector<16x16xf32> to vector<16xf32>
    %227 = vector.shape_cast %226 : vector<16xf32> to vector<16x1xf32>
    %228 = vector.broadcast %227 : vector<16x1xf32> to vector<16x16xf32>
    %229 = arith.subf %225, %228 : vector<16x16xf32>
    %230 = math.exp %229 : vector<16x16xf32>
    %cst_88 = arith.constant dense<0.000000e+00> : vector<16xf32>
    %231 = vector.multi_reduction <add>, %230, %cst_88 [1] : vector<16x16xf32> to vector<16xf32>
    %232 = vector.shape_cast %231 : vector<16xf32> to vector<16x1xf32>
    %233 = vector.broadcast %232 : vector<16x1xf32> to vector<16x16xf32>
    %234 = arith.divf %230, %233 : vector<16x16xf32>
    %c4 = arith.constant 4 : index
    %c0_89 = arith.constant 0 : index
    %c0_90 = arith.constant 0 : index
    %235 = vector.load %arg11[%c4, %c0_89, %c0_90] : memref<8x16x16xf32, #tpu.memory_space<vmem>>, vector<1x16x16xf32>
    %236 = vector.shape_cast %235 : vector<1x16x16xf32> to vector<16x16xf32>
    %237 = arith.addf %234, %236 : vector<16x16xf32>
    %238 = vector.broadcast %216 : vector<1x16xf32> to vector<16x16xf32>
    %239 = arith.mulf %75, %238 : vector<16x16xf32>
    %cst_91 = arith.constant dense<0.000000e+00> : vector<16x16xf32>
    %240 = tpu.matmul %237, %239, %cst_91 {dimension_numbers = #tpu.dot_dimension_numbers<[1], [0], [0], [1], [0, 0, 1, 1], [], []>} : vector<16x16xf32>, vector<16x16xf32>, vector<16x16xf32> -> vector<16x16xf32>
    %241 = arith.addf %209, %240 : vector<16x16xf32>
    %c10_i32_92 = arith.constant 10 : i32
    %242 = vector.broadcast %c10_i32_92 : i32 to vector<1x16xi32>
    %243 = arith.cmpi sge, %80, %242 : vector<1x16xi32>
    %c12_i32 = arith.constant 12 : i32
    %244 = vector.broadcast %c12_i32 : i32 to vector<1x16xi32>
    %245 = arith.cmpi slt, %80, %244 : vector<1x16xi32>
    %246 = arith.andi %243, %245 : vector<1x16xi1>
    %247 = arith.extui %246 : vector<1x16xi1> to vector<1x16xi32>
    %248 = arith.sitofp %247 : vector<1x16xi32> to vector<1x16xf32>
    %249 = vector.broadcast %248 : vector<1x16xf32> to vector<16x16xf32>
    %250 = arith.mulf %71, %249 : vector<16x16xf32>
    %cst_93 = arith.constant dense<0.000000e+00> : vector<16x16xf32>
    %251 = tpu.matmul %250, %73, %cst_93 {dimension_numbers = #tpu.dot_dimension_numbers<[1], [1], [0], [0], [0, 0, 1, 0], [], []>} : vector<16x16xf32>, vector<16x16xf32>, vector<16x16xf32> -> vector<16x16xf32>
    %cst_94 = arith.constant 2.500000e-01 : f32
    %252 = vector.broadcast %cst_94 : f32 to vector<16x16xf32>
    %253 = arith.mulf %251, %252 : vector<16x16xf32>
    %cst_95 = arith.constant -1.000000e+04 : f32
    %254 = vector.shape_cast %79 : vector<1x16xi1> to vector<1x16xi1>
    %255 = vector.broadcast %254 : vector<1x16xi1> to vector<16x16xi1>
    %256 = vector.broadcast %cst_95 : f32 to vector<16x16xf32>
    %257 = arith.select %255, %256, %253 : vector<16x16xi1>, vector<16x16xf32>
    %cst_96 = arith.constant dense<0xFF800000> : vector<16xf32>
    %258 = vector.multi_reduction <maximumf>, %257, %cst_96 [1] : vector<16x16xf32> to vector<16xf32>
    %259 = vector.shape_cast %258 : vector<16xf32> to vector<16x1xf32>
    %260 = vector.broadcast %259 : vector<16x1xf32> to vector<16x16xf32>
    %261 = arith.subf %257, %260 : vector<16x16xf32>
    %262 = math.exp %261 : vector<16x16xf32>
    %cst_97 = arith.constant dense<0.000000e+00> : vector<16xf32>
    %263 = vector.multi_reduction <add>, %262, %cst_97 [1] : vector<16x16xf32> to vector<16xf32>
    %264 = vector.shape_cast %263 : vector<16xf32> to vector<16x1xf32>
    %265 = vector.broadcast %264 : vector<16x1xf32> to vector<16x16xf32>
    %266 = arith.divf %262, %265 : vector<16x16xf32>
    %c5 = arith.constant 5 : index
    %c0_98 = arith.constant 0 : index
    %c0_99 = arith.constant 0 : index
    %267 = vector.load %arg11[%c5, %c0_98, %c0_99] : memref<8x16x16xf32, #tpu.memory_space<vmem>>, vector<1x16x16xf32>
    %268 = vector.shape_cast %267 : vector<1x16x16xf32> to vector<16x16xf32>
    %269 = arith.addf %266, %268 : vector<16x16xf32>
    %270 = vector.broadcast %248 : vector<1x16xf32> to vector<16x16xf32>
    %271 = arith.mulf %75, %270 : vector<16x16xf32>
    %cst_100 = arith.constant dense<0.000000e+00> : vector<16x16xf32>
    %272 = tpu.matmul %269, %271, %cst_100 {dimension_numbers = #tpu.dot_dimension_numbers<[1], [0], [0], [1], [0, 0, 1, 1], [], []>} : vector<16x16xf32>, vector<16x16xf32>, vector<16x16xf32> -> vector<16x16xf32>
    %273 = arith.addf %241, %272 : vector<16x16xf32>
    %c12_i32_101 = arith.constant 12 : i32
    %274 = vector.broadcast %c12_i32_101 : i32 to vector<1x16xi32>
    %275 = arith.cmpi sge, %80, %274 : vector<1x16xi32>
    %c14_i32 = arith.constant 14 : i32
    %276 = vector.broadcast %c14_i32 : i32 to vector<1x16xi32>
    %277 = arith.cmpi slt, %80, %276 : vector<1x16xi32>
    %278 = arith.andi %275, %277 : vector<1x16xi1>
    %279 = arith.extui %278 : vector<1x16xi1> to vector<1x16xi32>
    %280 = arith.sitofp %279 : vector<1x16xi32> to vector<1x16xf32>
    %281 = vector.broadcast %280 : vector<1x16xf32> to vector<16x16xf32>
    %282 = arith.mulf %71, %281 : vector<16x16xf32>
    %cst_102 = arith.constant dense<0.000000e+00> : vector<16x16xf32>
    %283 = tpu.matmul %282, %73, %cst_102 {dimension_numbers = #tpu.dot_dimension_numbers<[1], [1], [0], [0], [0, 0, 1, 0], [], []>} : vector<16x16xf32>, vector<16x16xf32>, vector<16x16xf32> -> vector<16x16xf32>
    %cst_103 = arith.constant 2.500000e-01 : f32
    %284 = vector.broadcast %cst_103 : f32 to vector<16x16xf32>
    %285 = arith.mulf %283, %284 : vector<16x16xf32>
    %cst_104 = arith.constant -1.000000e+04 : f32
    %286 = vector.shape_cast %79 : vector<1x16xi1> to vector<1x16xi1>
    %287 = vector.broadcast %286 : vector<1x16xi1> to vector<16x16xi1>
    %288 = vector.broadcast %cst_104 : f32 to vector<16x16xf32>
    %289 = arith.select %287, %288, %285 : vector<16x16xi1>, vector<16x16xf32>
    %cst_105 = arith.constant dense<0xFF800000> : vector<16xf32>
    %290 = vector.multi_reduction <maximumf>, %289, %cst_105 [1] : vector<16x16xf32> to vector<16xf32>
    %291 = vector.shape_cast %290 : vector<16xf32> to vector<16x1xf32>
    %292 = vector.broadcast %291 : vector<16x1xf32> to vector<16x16xf32>
    %293 = arith.subf %289, %292 : vector<16x16xf32>
    %294 = math.exp %293 : vector<16x16xf32>
    %cst_106 = arith.constant dense<0.000000e+00> : vector<16xf32>
    %295 = vector.multi_reduction <add>, %294, %cst_106 [1] : vector<16x16xf32> to vector<16xf32>
    %296 = vector.shape_cast %295 : vector<16xf32> to vector<16x1xf32>
    %297 = vector.broadcast %296 : vector<16x1xf32> to vector<16x16xf32>
    %298 = arith.divf %294, %297 : vector<16x16xf32>
    %c6 = arith.constant 6 : index
    %c0_107 = arith.constant 0 : index
    %c0_108 = arith.constant 0 : index
    %299 = vector.load %arg11[%c6, %c0_107, %c0_108] : memref<8x16x16xf32, #tpu.memory_space<vmem>>, vector<1x16x16xf32>
    %300 = vector.shape_cast %299 : vector<1x16x16xf32> to vector<16x16xf32>
    %301 = arith.addf %298, %300 : vector<16x16xf32>
    %302 = vector.broadcast %280 : vector<1x16xf32> to vector<16x16xf32>
    %303 = arith.mulf %75, %302 : vector<16x16xf32>
    %cst_109 = arith.constant dense<0.000000e+00> : vector<16x16xf32>
    %304 = tpu.matmul %301, %303, %cst_109 {dimension_numbers = #tpu.dot_dimension_numbers<[1], [0], [0], [1], [0, 0, 1, 1], [], []>} : vector<16x16xf32>, vector<16x16xf32>, vector<16x16xf32> -> vector<16x16xf32>
    %305 = arith.addf %273, %304 : vector<16x16xf32>
    %c14_i32_110 = arith.constant 14 : i32
    %306 = vector.broadcast %c14_i32_110 : i32 to vector<1x16xi32>
    %307 = arith.cmpi sge, %80, %306 : vector<1x16xi32>
    %c16_i32 = arith.constant 16 : i32
    %308 = vector.broadcast %c16_i32 : i32 to vector<1x16xi32>
    %309 = arith.cmpi slt, %80, %308 : vector<1x16xi32>
    %310 = arith.andi %307, %309 : vector<1x16xi1>
    %311 = arith.extui %310 : vector<1x16xi1> to vector<1x16xi32>
    %312 = arith.sitofp %311 : vector<1x16xi32> to vector<1x16xf32>
    %313 = vector.broadcast %312 : vector<1x16xf32> to vector<16x16xf32>
    %314 = arith.mulf %71, %313 : vector<16x16xf32>
    %cst_111 = arith.constant dense<0.000000e+00> : vector<16x16xf32>
    %315 = tpu.matmul %314, %73, %cst_111 {dimension_numbers = #tpu.dot_dimension_numbers<[1], [1], [0], [0], [0, 0, 1, 0], [], []>} : vector<16x16xf32>, vector<16x16xf32>, vector<16x16xf32> -> vector<16x16xf32>
    %cst_112 = arith.constant 2.500000e-01 : f32
    %316 = vector.broadcast %cst_112 : f32 to vector<16x16xf32>
    %317 = arith.mulf %315, %316 : vector<16x16xf32>
    %cst_113 = arith.constant -1.000000e+04 : f32
    %318 = vector.shape_cast %79 : vector<1x16xi1> to vector<1x16xi1>
    %319 = vector.broadcast %318 : vector<1x16xi1> to vector<16x16xi1>
    %320 = vector.broadcast %cst_113 : f32 to vector<16x16xf32>
    %321 = arith.select %319, %320, %317 : vector<16x16xi1>, vector<16x16xf32>
    %cst_114 = arith.constant dense<0xFF800000> : vector<16xf32>
    %322 = vector.multi_reduction <maximumf>, %321, %cst_114 [1] : vector<16x16xf32> to vector<16xf32>
    %323 = vector.shape_cast %322 : vector<16xf32> to vector<16x1xf32>
    %324 = vector.broadcast %323 : vector<16x1xf32> to vector<16x16xf32>
    %325 = arith.subf %321, %324 : vector<16x16xf32>
    %326 = math.exp %325 : vector<16x16xf32>
    %cst_115 = arith.constant dense<0.000000e+00> : vector<16xf32>
    %327 = vector.multi_reduction <add>, %326, %cst_115 [1] : vector<16x16xf32> to vector<16xf32>
    %328 = vector.shape_cast %327 : vector<16xf32> to vector<16x1xf32>
    %329 = vector.broadcast %328 : vector<16x1xf32> to vector<16x16xf32>
    %330 = arith.divf %326, %329 : vector<16x16xf32>
    %c7 = arith.constant 7 : index
    %c0_116 = arith.constant 0 : index
    %c0_117 = arith.constant 0 : index
    %331 = vector.load %arg11[%c7, %c0_116, %c0_117] : memref<8x16x16xf32, #tpu.memory_space<vmem>>, vector<1x16x16xf32>
    %332 = vector.shape_cast %331 : vector<1x16x16xf32> to vector<16x16xf32>
    %333 = arith.addf %330, %332 : vector<16x16xf32>
    %334 = vector.broadcast %312 : vector<1x16xf32> to vector<16x16xf32>
    %335 = arith.mulf %75, %334 : vector<16x16xf32>
    %cst_118 = arith.constant dense<0.000000e+00> : vector<16x16xf32>
    %336 = tpu.matmul %333, %335, %cst_118 {dimension_numbers = #tpu.dot_dimension_numbers<[1], [0], [0], [1], [0, 0, 1, 1], [], []>} : vector<16x16xf32>, vector<16x16xf32>, vector<16x16xf32> -> vector<16x16xf32>
    %337 = arith.addf %305, %336 : vector<16x16xf32>
    %c0_119 = arith.constant 0 : index
    %c0_120 = arith.constant 0 : index
    %338 = vector.load %arg12[%c0_119, %c0_120] : memref<1x16xf32, #tpu.memory_space<vmem>>, vector<1x16xf32>
    %c0_121 = arith.constant 0 : index
    %c0_122 = arith.constant 0 : index
    %339 = vector.load %arg13[%c0_121, %c0_122] : memref<1x16xf32, #tpu.memory_space<vmem>>, vector<1x16xf32>
    %cst_123 = arith.constant dense<0.000000e+00> : vector<16xf32>
    %340 = vector.multi_reduction <add>, %337, %cst_123 [1] : vector<16x16xf32> to vector<16xf32>
    %341 = vector.shape_cast %340 : vector<16xf32> to vector<16x1xf32>
    %cst_124 = arith.constant 1.600000e+01 : f32
    %342 = vector.broadcast %cst_124 : f32 to vector<16x1xf32>
    %343 = arith.divf %341, %342 : vector<16x1xf32>
    %344 = vector.broadcast %343 : vector<16x1xf32> to vector<16x16xf32>
    %345 = arith.subf %337, %344 : vector<16x16xf32>
    %346 = arith.mulf %345, %345 : vector<16x16xf32>
    %cst_125 = arith.constant dense<0.000000e+00> : vector<16xf32>
    %347 = vector.multi_reduction <add>, %346, %cst_125 [1] : vector<16x16xf32> to vector<16xf32>
    %348 = vector.shape_cast %347 : vector<16xf32> to vector<16x1xf32>
    %cst_126 = arith.constant 1.600000e+01 : f32
    %349 = vector.broadcast %cst_126 : f32 to vector<16x1xf32>
    %350 = arith.divf %348, %349 : vector<16x1xf32>
    %351 = vector.broadcast %343 : vector<16x1xf32> to vector<16x16xf32>
    %352 = arith.subf %337, %351 : vector<16x16xf32>
    %cst_127 = arith.constant 9.99999974E-6 : f32
    %353 = vector.broadcast %cst_127 : f32 to vector<16x1xf32>
    %354 = arith.addf %350, %353 : vector<16x1xf32>
    %355 = math.rsqrt %354 : vector<16x1xf32>
    %356 = vector.broadcast %355 : vector<16x1xf32> to vector<16x16xf32>
    %357 = arith.mulf %352, %356 : vector<16x16xf32>
    %358 = vector.broadcast %338 : vector<1x16xf32> to vector<16x16xf32>
    %359 = arith.mulf %357, %358 : vector<16x16xf32>
    %360 = vector.broadcast %339 : vector<1x16xf32> to vector<16x16xf32>
    %361 = arith.addf %359, %360 : vector<16x16xf32>
    %362 = arith.addf %66, %361 : vector<16x16xf32>
    %c0_128 = arith.constant 0 : index
    %c0_129 = arith.constant 0 : index
    %363 = vector.load %arg14[%c0_128, %c0_129] : memref<1x16xf32, #tpu.memory_space<vmem>>, vector<1x16xf32>
    %c0_130 = arith.constant 0 : index
    %c0_131 = arith.constant 0 : index
    %364 = vector.load %arg15[%c0_130, %c0_131] : memref<1x16xf32, #tpu.memory_space<vmem>>, vector<1x16xf32>
    %cst_132 = arith.constant dense<0.000000e+00> : vector<16xf32>
    %365 = vector.multi_reduction <add>, %362, %cst_132 [1] : vector<16x16xf32> to vector<16xf32>
    %366 = vector.shape_cast %365 : vector<16xf32> to vector<16x1xf32>
    %cst_133 = arith.constant 1.600000e+01 : f32
    %367 = vector.broadcast %cst_133 : f32 to vector<16x1xf32>
    %368 = arith.divf %366, %367 : vector<16x1xf32>
    %369 = vector.broadcast %368 : vector<16x1xf32> to vector<16x16xf32>
    %370 = arith.subf %362, %369 : vector<16x16xf32>
    %371 = arith.mulf %370, %370 : vector<16x16xf32>
    %cst_134 = arith.constant dense<0.000000e+00> : vector<16xf32>
    %372 = vector.multi_reduction <add>, %371, %cst_134 [1] : vector<16x16xf32> to vector<16xf32>
    %373 = vector.shape_cast %372 : vector<16xf32> to vector<16x1xf32>
    %cst_135 = arith.constant 1.600000e+01 : f32
    %374 = vector.broadcast %cst_135 : f32 to vector<16x1xf32>
    %375 = arith.divf %373, %374 : vector<16x1xf32>
    %376 = vector.broadcast %368 : vector<16x1xf32> to vector<16x16xf32>
    %377 = arith.subf %362, %376 : vector<16x16xf32>
    %cst_136 = arith.constant 9.99999974E-6 : f32
    %378 = vector.broadcast %cst_136 : f32 to vector<16x1xf32>
    %379 = arith.addf %375, %378 : vector<16x1xf32>
    %380 = math.rsqrt %379 : vector<16x1xf32>
    %381 = vector.broadcast %380 : vector<16x1xf32> to vector<16x16xf32>
    %382 = arith.mulf %377, %381 : vector<16x16xf32>
    %383 = vector.broadcast %363 : vector<1x16xf32> to vector<16x16xf32>
    %384 = arith.mulf %382, %383 : vector<16x16xf32>
    %385 = vector.broadcast %364 : vector<1x16xf32> to vector<16x16xf32>
    %386 = arith.addf %384, %385 : vector<16x16xf32>
    %c0_137 = arith.constant 0 : index
    %c0_138 = arith.constant 0 : index
    %387 = vector.load %arg16[%c0_137, %c0_138] : memref<16x32xbf16, #tpu.memory_space<vmem>>, vector<16x32xbf16>
    %388 = arith.truncf %386 : vector<16x16xf32> to vector<16x16xbf16>
    %cst_139 = arith.constant dense<0.000000e+00> : vector<16x32xf32>
    %389 = tpu.matmul %388, %387, %cst_139 {dimension_numbers = #tpu.dot_dimension_numbers<[1], [0], [0], [1], [0, 0, 1, 1], [], []>} : vector<16x16xbf16>, vector<16x32xbf16>, vector<16x32xf32> -> vector<16x32xf32>
    %c0_140 = arith.constant 0 : index
    %c0_141 = arith.constant 0 : index
    %390 = vector.load %arg17[%c0_140, %c0_141] : memref<1x32xf32, #tpu.memory_space<vmem>>, vector<1x32xf32>
    %391 = vector.broadcast %390 : vector<1x32xf32> to vector<16x32xf32>
    %392 = arith.addf %389, %391 : vector<16x32xf32>
    %cst_142 = arith.constant 0.000000e+00 : f32
    %393 = vector.broadcast %cst_142 : f32 to vector<16x32xf32>
    %394 = arith.maximumf %392, %393 : vector<16x32xf32>
    %c0_143 = arith.constant 0 : index
    %c0_144 = arith.constant 0 : index
    %395 = vector.load %arg18[%c0_143, %c0_144] : memref<32x16xbf16, #tpu.memory_space<vmem>>, vector<32x16xbf16>
    %396 = arith.truncf %394 : vector<16x32xf32> to vector<16x32xbf16>
    %cst_145 = arith.constant dense<0.000000e+00> : vector<16x16xf32>
    %397 = tpu.matmul %396, %395, %cst_145 {dimension_numbers = #tpu.dot_dimension_numbers<[1], [0], [0], [1], [0, 0, 1, 1], [], []>} : vector<16x32xbf16>, vector<32x16xbf16>, vector<16x16xf32> -> vector<16x16xf32>
    %c0_146 = arith.constant 0 : index
    %c0_147 = arith.constant 0 : index
    %398 = vector.load %arg19[%c0_146, %c0_147] : memref<1x16xf32, #tpu.memory_space<vmem>>, vector<1x16xf32>
    %399 = vector.broadcast %398 : vector<1x16xf32> to vector<16x16xf32>
    %400 = arith.addf %397, %399 : vector<16x16xf32>
    %401 = arith.addf %386, %400 : vector<16x16xf32>
    %c0_148 = arith.constant 0 : index
    %c0_149 = arith.constant 0 : index
    %402 = vector.load %arg20[%c0_148, %c0_149] : memref<1x16xf32, #tpu.memory_space<vmem>>, vector<1x16xf32>
    %c0_150 = arith.constant 0 : index
    %c0_151 = arith.constant 0 : index
    %403 = vector.load %arg21[%c0_150, %c0_151] : memref<1x16xf32, #tpu.memory_space<vmem>>, vector<1x16xf32>
    %cst_152 = arith.constant dense<0.000000e+00> : vector<16xf32>
    %404 = vector.multi_reduction <add>, %401, %cst_152 [1] : vector<16x16xf32> to vector<16xf32>
    %405 = vector.shape_cast %404 : vector<16xf32> to vector<16x1xf32>
    %cst_153 = arith.constant 1.600000e+01 : f32
    %406 = vector.broadcast %cst_153 : f32 to vector<16x1xf32>
    %407 = arith.divf %405, %406 : vector<16x1xf32>
    %408 = vector.broadcast %407 : vector<16x1xf32> to vector<16x16xf32>
    %409 = arith.subf %401, %408 : vector<16x16xf32>
    %410 = arith.mulf %409, %409 : vector<16x16xf32>
    %cst_154 = arith.constant dense<0.000000e+00> : vector<16xf32>
    %411 = vector.multi_reduction <add>, %410, %cst_154 [1] : vector<16x16xf32> to vector<16xf32>
    %412 = vector.shape_cast %411 : vector<16xf32> to vector<16x1xf32>
    %cst_155 = arith.constant 1.600000e+01 : f32
    %413 = vector.broadcast %cst_155 : f32 to vector<16x1xf32>
    %414 = arith.divf %412, %413 : vector<16x1xf32>
    %415 = vector.broadcast %407 : vector<16x1xf32> to vector<16x16xf32>
    %416 = arith.subf %401, %415 : vector<16x16xf32>
    %cst_156 = arith.constant 9.99999974E-6 : f32
    %417 = vector.broadcast %cst_156 : f32 to vector<16x1xf32>
    %418 = arith.addf %414, %417 : vector<16x1xf32>
    %419 = math.rsqrt %418 : vector<16x1xf32>
    %420 = vector.broadcast %419 : vector<16x1xf32> to vector<16x16xf32>
    %421 = arith.mulf %416, %420 : vector<16x16xf32>
    %422 = vector.broadcast %402 : vector<1x16xf32> to vector<16x16xf32>
    %423 = arith.mulf %421, %422 : vector<16x16xf32>
    %424 = vector.broadcast %403 : vector<1x16xf32> to vector<16x16xf32>
    %425 = arith.addf %423, %424 : vector<16x16xf32>
    %cst_157 = arith.constant dense<0.000000e+00> : vector<16xf32>
    %426 = vector.multi_reduction <add>, %425, %cst_157 [0] : vector<16x16xf32> to vector<16xf32>
    %427 = vector.shape_cast %426 : vector<16xf32> to vector<1x16xf32>
    %cst_158 = arith.constant 1.600000e+01 : f32
    %428 = vector.broadcast %cst_158 : f32 to vector<1x16xf32>
    %429 = arith.divf %427, %428 : vector<1x16xf32>
    %c0_159 = arith.constant 0 : index
    %c0_160 = arith.constant 0 : index
    %c0_161 = arith.constant 0 : index
    %430 = vector.load %arg24[%c0_159, %c0_160, %c0_161] : memref<1x16x16xf32, #tpu.memory_space<vmem>>, vector<1x16x16xf32>
    %431 = vector.shape_cast %430 : vector<1x16x16xf32> to vector<16x16xf32>
    %432 = vector.shape_cast %425 : vector<16x16xf32> to vector<1x16x16xf32>
    tpu.vector_store %arg24[%c0_159, %c0_160, %c0_161], %432 {strides = array<i32>} : memref<1x16x16xf32, #tpu.memory_space<vmem>>, vector<1x16x16xf32>,
    %c0_162 = arith.constant 0 : index
    %c0_163 = arith.constant 0 : index
    %c0_164 = arith.constant 0 : index
    %433 = vector.load %arg25[%c0_162, %c0_163, %c0_164] : memref<1x1x16xf32, #tpu.memory_space<vmem>>, vector<1x1x16xf32>
    %434 = vector.shape_cast %433 : vector<1x1x16xf32> to vector<1x16xf32>
    %435 = vector.shape_cast %429 : vector<1x16xf32> to vector<1x1x16xf32>
    tpu.vector_store %arg25[%c0_162, %c0_163, %c0_164], %435 {strides = array<i32>} : memref<1x1x16xf32, #tpu.memory_space<vmem>>, vector<1x1x16xf32>,
    %c0_165 = arith.constant 0 : index
    %c0_166 = arith.constant 0 : index
    %436 = vector.load %arg22[%c0_165, %c0_166] : memref<16x11xbf16, #tpu.memory_space<vmem>>, vector<16x11xbf16>
    %437 = arith.truncf %429 : vector<1x16xf32> to vector<1x16xbf16>
    %cst_167 = arith.constant dense<0.000000e+00> : vector<1x11xf32>
    %438 = tpu.matmul %437, %436, %cst_167 {dimension_numbers = #tpu.dot_dimension_numbers<[1], [0], [0], [1], [0, 0, 1, 1], [], []>} : vector<1x16xbf16>, vector<16x11xbf16>, vector<1x11xf32> -> vector<1x11xf32>
    %c0_168 = arith.constant 0 : index
    %c0_169 = arith.constant 0 : index
    %439 = vector.load %arg23[%c0_168, %c0_169] : memref<1x11xf32, #tpu.memory_space<vmem>>, vector<1x11xf32>
    %440 = arith.addf %438, %439 : vector<1x11xf32>
    %c0_170 = arith.constant 0 : index
    %c0_171 = arith.constant 0 : index
    %c0_172 = arith.constant 0 : index
    %441 = vector.load %arg26[%c0_170, %c0_171, %c0_172] : memref<1x1x11xf32, #tpu.memory_space<vmem>>, vector<1x1x11xf32>
    %442 = vector.shape_cast %441 : vector<1x1x11xf32> to vector<1x11xf32>
    %443 = vector.shape_cast %440 : vector<1x11xf32> to vector<1x1x11xf32>
    tpu.vector_store %arg26[%c0_170, %c0_171, %c0_172], %443 {strides = array<i32>} : memref<1x1x11xf32, #tpu.memory_space<vmem>>, vector<1x1x11xf32>,
    return
  }
  func.func @transform_0(%arg0: i32) -> (i32, i32, i32) {
    %c0_i32 = arith.constant 0 : i32
    %c0_i32_0 = arith.constant 0 : i32
    %c0_i32_1 = arith.constant 0 : i32
    return %arg0, %c0_i32, %c0_i32_0 : i32, i32, i32
  }
  func.func @transform_1(%arg0: i32) -> (i32, i32, i32) {
    %c0_i32 = arith.constant 0 : i32
    %c0_i32_0 = arith.constant 0 : i32
    %c0_i32_1 = arith.constant 0 : i32
    return %arg0, %c0_i32, %c0_i32_0 : i32, i32, i32
  }
  func.func @transform_2(%arg0: i32) -> (i32, i32) {
    %c0_i32 = arith.constant 0 : i32
    %c0_i32_0 = arith.constant 0 : i32
    %c0_i32_1 = arith.constant 0 : i32
    return %c0_i32, %c0_i32_0 : i32, i32
  }
  func.func @transform_3(%arg0: i32) -> (i32, i32) {
    %c0_i32 = arith.constant 0 : i32
    %c0_i32_0 = arith.constant 0 : i32
    %c0_i32_1 = arith.constant 0 : i32
    return %c0_i32, %c0_i32_0 : i32, i32
  }
  func.func @transform_4(%arg0: i32) -> (i32, i32, i32) {
    %c0_i32 = arith.constant 0 : i32
    %c0_i32_0 = arith.constant 0 : i32
    %c0_i32_1 = arith.constant 0 : i32
    %c0_i32_2 = arith.constant 0 : i32
    return %c0_i32, %c0_i32_0, %c0_i32_1 : i32, i32, i32
  }
  func.func @transform_5(%arg0: i32) -> (i32, i32) {
    %c0_i32 = arith.constant 0 : i32
    %c0_i32_0 = arith.constant 0 : i32
    %c0_i32_1 = arith.constant 0 : i32
    return %c0_i32, %c0_i32_0 : i32, i32
  }
  func.func @transform_6(%arg0: i32) -> (i32, i32) {
    %c0_i32 = arith.constant 0 : i32
    %c0_i32_0 = arith.constant 0 : i32
    %c0_i32_1 = arith.constant 0 : i32
    return %c0_i32, %c0_i32_0 : i32, i32
  }
  func.func @transform_7(%arg0: i32) -> (i32, i32) {
    %c0_i32 = arith.constant 0 : i32
    %c0_i32_0 = arith.constant 0 : i32
    %c0_i32_1 = arith.constant 0 : i32
    return %c0_i32, %c0_i32_0 : i32, i32
  }
  func.func @transform_8(%arg0: i32) -> (i32, i32) {
    %c0_i32 = arith.constant 0 : i32
    %c0_i32_0 = arith.constant 0 : i32
    %c0_i32_1 = arith.constant 0 : i32
    return %c0_i32, %c0_i32_0 : i32, i32
  }
  func.func @transform_9(%arg0: i32) -> (i32, i32) {
    %c0_i32 = arith.constant 0 : i32
    %c0_i32_0 = arith.constant 0 : i32
    %c0_i32_1 = arith.constant 0 : i32
    return %c0_i32, %c0_i32_0 : i32, i32
  }
  func.func @transform_10(%arg0: i32) -> (i32, i32, i32) {
    %c0_i32 = arith.constant 0 : i32
    %c0_i32_0 = arith.constant 0 : i32
    %c0_i32_1 = arith.constant 0 : i32
    %c0_i32_2 = arith.constant 0 : i32
    return %c0_i32, %c0_i32_0, %c0_i32_1 : i32, i32, i32
  }
  func.func @transform_11(%arg0: i32) -> (i32, i32) {
    %c0_i32 = arith.constant 0 : i32
    %c0_i32_0 = arith.constant 0 : i32
    %c0_i32_1 = arith.constant 0 : i32
    return %c0_i32, %c0_i32_0 : i32, i32
  }
  func.func @transform_12(%arg0: i32) -> (i32, i32) {
    %c0_i32 = arith.constant 0 : i32
    %c0_i32_0 = arith.constant 0 : i32
    %c0_i32_1 = arith.constant 0 : i32
    return %c0_i32, %c0_i32_0 : i32, i32
  }
  func.func @transform_13(%arg0: i32) -> (i32, i32) {
    %c0_i32 = arith.constant 0 : i32
    %c0_i32_0 = arith.constant 0 : i32
    %c0_i32_1 = arith.constant 0 : i32
    return %c0_i32, %c0_i32_0 : i32, i32
  }
  func.func @transform_14(%arg0: i32) -> (i32, i32) {
    %c0_i32 = arith.constant 0 : i32
    %c0_i32_0 = arith.constant 0 : i32
    %c0_i32_1 = arith.constant 0 : i32
    return %c0_i32, %c0_i32_0 : i32, i32
  }
  func.func @transform_15(%arg0: i32) -> (i32, i32) {
    %c0_i32 = arith.constant 0 : i32
    %c0_i32_0 = arith.constant 0 : i32
    %c0_i32_1 = arith.constant 0 : i32
    return %c0_i32, %c0_i32_0 : i32, i32
  }
  func.func @transform_16(%arg0: i32) -> (i32, i32) {
    %c0_i32 = arith.constant 0 : i32
    %c0_i32_0 = arith.constant 0 : i32
    %c0_i32_1 = arith.constant 0 : i32
    return %c0_i32, %c0_i32_0 : i32, i32
  }
  func.func @transform_17(%arg0: i32) -> (i32, i32) {
    %c0_i32 = arith.constant 0 : i32
    %c0_i32_0 = arith.constant 0 : i32
    %c0_i32_1 = arith.constant 0 : i32
    return %c0_i32, %c0_i32_0 : i32, i32
  }
  func.func @transform_18(%arg0: i32) -> (i32, i32) {
    %c0_i32 = arith.constant 0 : i32
    %c0_i32_0 = arith.constant 0 : i32
    %c0_i32_1 = arith.constant 0 : i32
    return %c0_i32, %c0_i32_0 : i32, i32
  }
  func.func @transform_19(%arg0: i32) -> (i32, i32) {
    %c0_i32 = arith.constant 0 : i32
    %c0_i32_0 = arith.constant 0 : i32
    %c0_i32_1 = arith.constant 0 : i32
    return %c0_i32, %c0_i32_0 : i32, i32
  }
  func.func @transform_20(%arg0: i32) -> (i32, i32) {
    %c0_i32 = arith.constant 0 : i32
    %c0_i32_0 = arith.constant 0 : i32
    %c0_i32_1 = arith.constant 0 : i32
    return %c0_i32, %c0_i32_0 : i32, i32
  }
  func.func @transform_21(%arg0: i32) -> (i32, i32) {
    %c0_i32 = arith.constant 0 : i32
    %c0_i32_0 = arith.constant 0 : i32
    %c0_i32_1 = arith.constant 0 : i32
    return %c0_i32, %c0_i32_0 : i32, i32
  }
  func.func @transform_22(%arg0: i32) -> (i32, i32) {
    %c0_i32 = arith.constant 0 : i32
    %c0_i32_0 = arith.constant 0 : i32
    %c0_i32_1 = arith.constant 0 : i32
    return %c0_i32, %c0_i32_0 : i32, i32
  }
  func.func @transform_23(%arg0: i32) -> (i32, i32, i32) {
    %c0_i32 = arith.constant 0 : i32
    %c0_i32_0 = arith.constant 0 : i32
    %c0_i32_1 = arith.constant 0 : i32
    return %arg0, %c0_i32, %c0_i32_0 : i32, i32, i32
  }
  func.func @transform_24(%arg0: i32) -> (i32, i32, i32) {
    %c0_i32 = arith.constant 0 : i32
    %c0_i32_0 = arith.constant 0 : i32
    %c0_i32_1 = arith.constant 0 : i32
    return %arg0, %c0_i32, %c0_i32_0 : i32, i32, i32
  }
  func.func @transform_25(%arg0: i32) -> (i32, i32, i32) {
    %c0_i32 = arith.constant 0 : i32
    %c0_i32_0 = arith.constant 0 : i32
    %c0_i32_1 = arith.constant 0 : i32
    return %arg0, %c0_i32, %c0_i32_0 : i32, i32, i32
  }
}

</mosaic_0001>

<bundles_post_ra>
// kernel: tpu_custom_call.1
= control target key start
LH: loop header
LB: loop body
LE: loop exit
PB: predicated region body
PF: predicated region fallthrough
CT: control target
= control target key end

     0   :  { %s5418_s0 = inlined_call_operand.vmem [shape: f32[2,16,12], index: 0, kind: input, shape index: {}]   ;;  %s5419_s1 = inlined_call_operand.hbm [shape: f32[2,1,16], index: 1, kind: input, shape index: {}]   ;;  %s5420_s2 = inlined_call_operand.vmem [shape: bf16[12,16], index: 2, kind: input, shape index: {}]   ;;  %s5421_s3 = inlined_call_operand.vmem [shape: f32[1,16], index: 3, kind: input, shape index: {}]   ;;  %s5422_s4 = inlined_call_operand.vmem [shape: bf16[3,16,16], index: 4, kind: input, shape index: {}]   ;;  %s5423_s5 = inlined_call_operand.hbm [shape: f32[1,16], index: 5, kind: input, shape index: {}]   ;;  %s5424_s6 = inlined_call_operand.vmem [shape: f32[16,16], index: 6, kind: input, shape index: {}]   ;;  %s5425_s7 = inlined_call_operand.vmem [shape: bf16[16,16], index: 7, kind: input, shape index: {}]   ;;  %s5426_s8 = inlined_call_operand.vmem [shape: bf16[16,16], index: 8, kind: input, shape index: {}]   ;;  %s5427_s9 = inlined_call_operand.vmem [shape: bf16[16,16], index: 9, kind: input, shape index: {}]   ;;  %s5428_s10 = inlined_call_operand.hbm [shape: f32[8,16,16], index: 10, kind: input, shape index: {}]   ;;  %s5429_s11 = inlined_call_operand.hbm [shape: f32[1,16], index: 11, kind: input, shape index: {}]   ;;  %s5430_s12 = inlined_call_operand.vmem [shape: f32[1,16], index: 12, kind: input, shape index: {}]   ;;  %s5431_s13 = inlined_call_operand.vmem [shape: f32[1,16], index: 13, kind: input, shape index: {}]   ;;  %s5432_s14 = inlined_call_operand.vmem [shape: f32[1,16], index: 14, kind: input, shape index: {}]   ;;  %s5433_s15 = inlined_call_operand.vmem [shape: bf16[16,32], index: 15, kind: input, shape index: {}]   ;;  %s5434_s16 = inlined_call_operand.vmem [shape: f32[1,32], index: 16, kind: input, shape index: {}]   ;;  %s5435_s17 = inlined_call_operand.vmem [shape: bf16[32,16], index: 17, kind: input, shape index: {}]   ;;  %s5436_s18 = inlined_call_operand.vmem [shape: f32[1,16], index: 18, kind: input, shape index: {}]   ;;  %s5437_s19 = inlined_call_operand.vmem [shape: f32[1,16], index: 19, kind: input, shape index: {}]   ;;  %s5438_s20 = inlined_call_operand.vmem [shape: f32[1,16], index: 20, kind: input, shape index: {}]   ;;  %s5439_s21 = inlined_call_operand.vmem [shape: bf16[16,11], index: 21, kind: input, shape index: {}]   ;;  %s5440_s22 = inlined_call_operand.vmem [shape: f32[1,11], index: 22, kind: input, shape index: {}]   ;;  %s5441_s23 = inlined_call_operand.hbm [shape: f32[2,16,16], index: 23, kind: output, shape index: {0}]   ;;  %s5442_s24 = inlined_call_operand.hbm [shape: f32[2,1,16], index: 24, kind: output, shape index: {1}]   ;;  %s5443_s25 = inlined_call_operand.hbm [shape: f32[2,1,11], index: 25, kind: output, shape index: {2}]  }
   0x1   :  { %5461 = sst [smem:[#allocation21_spill]] %s5418_s0 }
   0x2   :  { %5462 = sst [smem:[#allocation22_spill]] %s5419_s1 }
   0x3   :  { %5463 = sst [smem:[#allocation23_spill]] %s5420_s2 }
   0x4   :  { %5464 = sst [smem:[#allocation24_spill]] %s5421_s3 }
   0x5   :  { %5465 = sst [smem:[#allocation25_spill]] %s5422_s4 }
   0x6   :  { %5466 = sst [smem:[#allocation26_spill]] %s5423_s5 }
   0x7   :  { %5467 = sst [smem:[#allocation27_spill]] %s5424_s6 }
   0x8   :  { %5468 = sst [smem:[#allocation28_spill]] %s5425_s7 }
   0x9   :  { %5469 = sst [smem:[#allocation29_spill]] %s5426_s8 }
   0xa   :  { %5470 = sst [smem:[#allocation30_spill]] %s5427_s9 }
   0xb   :  { %5471 = sst [smem:[#allocation31_spill]] %s5428_s10 }
   0xc   :  { %5472 = sst [smem:[#allocation32_spill]] %s5429_s11 }
   0xd   :  { %5473 = sst [smem:[#allocation33_spill]] %s5430_s12 }
   0xe   :  { %5474 = sst [smem:[#allocation34_spill]] %s5431_s13 }
   0xf   :  { %5475 = sst [smem:[#allocation35_spill]] %s5432_s14 }
  0x10   :  { %5476 = sst [smem:[#allocation36_spill]] %s5433_s15 }
  0x11   :  { %5477 = sst [smem:[#allocation37_spill]] %s5437_s19 }
  0x12   :  { %5478 = sst [smem:[#allocation38_spill]] %s5438_s20 }
  0x13   :  { %5479 = sst [smem:[#allocation39_spill]] %s5440_s22 }
  0x14   :  { %5480 = sst [smem:[#allocation40_spill]] %s5441_s23 }
  0x15   :  { %5481 = sst [smem:[#allocation41_spill]] %s5442_s24 }
  0x16   :  { %5482 = sst [smem:[#allocation42_spill]] %s5443_s25 }
  0x17   :  { %31 = vsyncpa [#allocation3], 0 }
  0x18   :  { %33 = vsyncpa [#allocation3 + $0x1], 0 }
  0x19   :  { %34 = vsyncpa [#allocation6], 0 }
  0x1a   :  { %35 = vsyncpa [#allocation9], 0 }
  0x1b   :  { %36 = vsyncpa [#allocation4], 0 }
  0x1c   :  { %38 = vsyncpa [#allocation4 + $0x1], 0 }
  0x1d   :  { %39 = vsyncpa [#allocation12], 0 }
  0x1e   :  { %41 = vsyncpa [#allocation12 + $0x1], 0  ;;  %s4656_s29 = smov 0   ;;  %s4658_s2 = smov 0  }
  0x1f   :  { %s4660_s6 = smov 0   ;;  %s4662_s30 = smov 0  }
  0x20 LB: > { %5483 = sst [smem:[#allocation19_spill]] %s4498_s29  ;;  %s4677_s7 = sadd.s32 4294967295, %s4510_s30   ;;  %s4510_s30 = sphi %s4662_s30, %s5538_s30   ;;  %s4506_s6 = sphi %s4660_s6, %s5537_s6   ;;  %s4502_s2 = sphi %s4658_s2, %s5536_s2   ;;  %s4498_s29 = sphi %s4656_s29, %s5535_s29  }
  0x21   : > { %s5448_s3 = sadd.s32 4294967294, %s4510_s30   ;;  %p93_p0 = scmp.ne.s32.totalorder %s4502_s2, %s4498_s29 }
  0x22   : > { %p5454_p1 = scmp.eq.s32.totalorder %s4677_s7, 0  ;;  %p564_p3 = scmp.eq.s32.totalorder %s5448_s3, 1 }
  0x23   : > { %p3585_p5 = scmp.ge.s32.totalorder %s4510_s30, 1  ;;  %p623_p7 = scmp.lt.s32.totalorder %s4510_s30, 3 }
  0x24   : > { %p4688_p4 = por %p5454_p1, %p93_p0  ;;  %p4693_p6 = por %p564_p3, %p93_p0 }
  0x25   : > { %p4698_p8 = pnand %p3585_p5, %p623_p7  ;;  %s4512_s27 = smov [#allocation5]  }
  0x26   : > { %s5484_s26 = scalar_select %p4688_p4, 1, 0 }
  0x27   : > { %s5485_s1 = scalar_select %p4693_p6, 1, 0 }
  0x28   : > { %s5487_s8 = scalar_select %p4698_p8, 1, 0 }
  0x29   : > { %5486 = sst [smem:[#allocation20_spill]] %s5485_s1  ;;  %s645_s4 = sshll.u32 %s4512_s27, 4  ;;  %s646_s4 = int_to_ptr.vmem [resolvable:$true] %s645_s4 }
  0x2a   : > { %p4093_p10 = pneg %p4698_p8  ;;  %s4513_s28 = smov [#allocation7]  }
  0x2b   : > { %s667_s9 = sshll.u32 %s4513_s28, 4  ;;  %s4514_s0 = smov [#allocation8]   ;;  %s4711_s9 = int_to_ptr.vmem [resolvable:$true] %s667_s9 }
  0x2c   : > { %p4707_p11 = pnand %p4093_p10, %p5454_p1  ;;  %s4713_s3 = sshll.u32 %s4514_s0, 4  ;;  %s682_s3 = int_to_ptr.vmem [resolvable:$true] %s4713_s3 }
  0x2d   : > { %s5489_s27 = sld [smem:[#allocation26_spill]] }
  0x2e   : > { %p4723_p13 = pneg %p4707_p11 }
  0x33   : > { %s4262_s25 = scalar_lea.hbm %s5489_s27, 16 }
  0x34   : > { %p4263_p12 = scmp.ne.s32.totalorder %s5489_s27, %s4262_s25  ;;  %p4269_p5 = scmp.lt.u32.totalorder %s4262_s25, %s5489_s27 }
  0x36   : > { %p4265_p0 = pnand %p4723_p13, %p4263_p12 }
  0x38   : > { %p4266_p3 = pneg %p4265_p0 }
  0x3a   : > { %p4271_p7 = pnand %p4269_p5, %p4266_p3 }
  0x3c   : > { %4274 = shalt.err (!%p4271_p7)
}
  0x3d   : > { %s4275_s29 = scalar_lea.vmem %s646_s4, 16  ;;  %s4282_s22 = scalar_lea.vmem %s646_s4, 32 }
  0x3e   : > { %p4276_p10 = scmp.ne.s32.totalorder %s646_s4, %s4275_s29  ;;  %p4283_p2 = scmp.lt.s32.totalorder %s646_s4, %s646_s4 }
  0x3f   : > { %p4284_p6 = scmp.lt.s32.totalorder %s4282_s22, %s4275_s29 }
  0x40   : > { %p4278_p9 = pnand %p4276_p10, %p4723_p13 }
  0x41   : > { %p4285_p4 = por %p4284_p6, %p4283_p2 }
  0x42   : > { %p4279_p1 = pneg %p4278_p9 }
  0x44   : > { %p4286_p8 = pnand %p4285_p4, %p4279_p1 }
  0x46   : > { %4289 = shalt.err (!%p4286_p8)
}
  0x47   : > { %4096 = dma.hbm_to_vmem [thread:$0]  (!%p4707_p11), %s5489_s27, 16, %s646_s4, [#allocation6]  }
  0x48   : > { %s5491_s10 = sld [smem:[#allocation31_spill]] }
  0x4e   : > { %s4290_s0 = scalar_lea.hbm %s5491_s10, 2048 }
  0x4f   : > { %p4291_p9 = scmp.ne.s32.totalorder %s5491_s10, %s4290_s0  ;;  %p4297_p1 = scmp.lt.u32.totalorder %s4290_s0, %s5491_s10 }
  0x51   : > { %p4293_p12 = pnand %p4291_p9, %p4723_p13 }
  0x53   : > { %p4294_p2 = pneg %p4293_p12 }
  0x55   : > { %p4299_p4 = pnand %p4297_p1, %p4294_p2 }
  0x57   : > { %4302 = shalt.err (!%p4299_p4)
}
  0x58   : > { %s4303_s4 = scalar_lea.vmem %s4711_s9, 2048  ;;  %p4311_p3 = scmp.lt.s32.totalorder %s4711_s9, %s4711_s9 }
  0x59   : > { %p4304_p6 = scmp.ne.s32.totalorder %s4711_s9, %s4303_s4  ;;  %p4312_p5 = scmp.lt.s32.totalorder %s4303_s4, %s4303_s4 }
  0x5b   : > { %p4306_p8 = pnand %p4304_p6, %p4723_p13  ;;  %p4313_p7 = por %p4312_p5, %p4311_p3 }
  0x5d   : > { %p4307_p0 = pneg %p4306_p8 }
  0x5f   : > { %p4314_p10 = pnand %p4313_p7, %p4307_p0 }
  0x61   : > { %4317 = shalt.err (!%p4314_p10)
}
  0x62   : > { %s4515_s19 = smov 128   ;;  %s4516_s20 = smov 8  }
  0x63   : > { %4099 = dma.hbm_to_vmem [thread:$0]  (!%p4707_p11), %s5491_s10, 2048, %s4711_s9, [#allocation6], %s4515_s19, %s4515_s19, %s4516_s20  }
  0x64   : > { %s5492_s11 = sld [smem:[#allocation32_spill]] }
  0x6a   : > { %s4318_s0 = scalar_lea.hbm %s5492_s11, 16 }
  0x6b   : > { %p4319_p9 = scmp.ne.s32.totalorder %s5492_s11, %s4318_s0  ;;  %p4325_p1 = scmp.lt.u32.totalorder %s4318_s0, %s5492_s11 }
  0x6d   : > { %p4321_p12 = pnand %p4319_p9, %p4723_p13 }
  0x6f   : > { %p4322_p2 = pneg %p4321_p12 }
  0x71   : > { %p4327_p4 = pnand %p4325_p1, %p4322_p2 }
  0x73   : > { %4330 = shalt.err (!%p4327_p4)
}
  0x74   : > { %s4331_s23 = scalar_lea.vmem %s682_s3, 16  ;;  %s4338_s9 = scalar_lea.vmem %s682_s3, 32 }
  0x75   : > { %p4332_p6 = scmp.ne.s32.totalorder %s682_s3, %s4331_s23  ;;  %p4339_p3 = scmp.lt.s32.totalorder %s682_s3, %s682_s3 }
  0x76   : > { %p4340_p5 = scmp.lt.s32.totalorder %s4338_s9, %s4331_s23 }
  0x77   : > { %p4334_p8 = pnand %p4332_p6, %p4723_p13 }
  0x78   : > { %p4341_p7 = por %p4340_p5, %p4339_p3 }
  0x79   : > { %p4335_p0 = pneg %p4334_p8 }
  0x7b   : > { %p4342_p10 = pnand %p4341_p7, %p4335_p0 }
  0x7d   : > { %4345 = shalt.err (!%p4342_p10)
}
  0x7e   : > { %4102 = dma.hbm_to_vmem [thread:$0]  (!%p4707_p11), %s5492_s11, 16, %s682_s3, [#allocation9]  }
  0x7f   : > { %s4782_s27 = sadd.s32 1, %s4510_s30   ;;  %s80_s5 = sadd.s32 1, %s4506_s6 }
  0x80   : > { %s77_s28 = ssub.s32 %s4510_s30, %s4782_s27  ;;  %p87_p9 = scmp.ne.s32.totalorder %s4506_s6, %s4502_s2 }
  0x81   : > { %p78_p13 = scmp.eq.s32.totalorder %s77_s28, 0  ;;  %p88_p12 = scmp.eq.s32.totalorder %s4510_s30, 0 }
  0x82   : > { %p4120_p2 = scmp.lt.s32.totalorder %s4510_s30, 2  ;;  %p5493_p4 = scmp.eq.s32.totalorder %s4677_s7, 1 }
  0x83   : > { %s4792_s1 = scalar_select %p78_p13, %s4506_s6, %s80_s5  }
  0x84   : > { %p89_p1 = por %p88_p12, %p87_p9  ;;  %p4796_p6 = por %p5493_p4, %p87_p9 }
  0x85   : > { %s733_s25 = sand.u32 1, %s4506_s6   ;;  %s3590_s0 = sshll.u32 %s4510_s30, 4 }
  0x86   : > { %s5495_s22 = sld [smem:[#allocation22_spill]]  ;;  %s736_s23 = scalar_lea.vmem [#allocation2], %s733_s25 }
  0x87   : > { %s743_s9 = sshll.u32 %s736_s23, 4  ;;  %p4809_p11 = pnand %p4120_p2, %p89_p1  ;;  %s4807_s9 = int_to_ptr.vmem [resolvable:$true] %s743_s9 }
  0x88   : > { %s734_s20 = scalar_lea.sflag [#allocation3], %s733_s25 }
  0x89   : > { %p4348_p0 = pneg %p4809_p11 }
  0x8c   : > { %s4805_s4 = scalar_lea.hbm %s5495_s22, %s3590_s0  ;;  %s4351_s3 = scalar_lea.hbm %s5495_s22, 32 }
  0x8d   : > { %s4346_s28 = scalar_lea.hbm %s4805_s4, 16  ;;  %p4352_p7 = scmp.lt.u32.totalorder %s4805_s4, %s5495_s22 }
  0x8e   : > { %p4347_p8 = scmp.ne.s32.totalorder %s4805_s4, %s4346_s28  ;;  %p4353_p10 = scmp.lt.u32.totalorder %s4351_s3, %s4346_s28 }
  0x8f   : > { %p4355_p9 = scmp.lt.u32.totalorder %s4346_s28, %s4805_s4 }
  0x90   : > { %p4349_p3 = pnand %p4348_p0, %p4347_p8  ;;  %p4354_p13 = por %p4353_p10, %p4352_p7 }
  0x92   : > { %p4350_p5 = pneg %p4349_p3  ;;  %p4356_p12 = por %p4355_p9, %p4354_p13 }
  0x94   : > { %p4357_p2 = pnand %p4356_p12, %p4350_p5 }
  0x96   : > { %4360 = shalt.err (!%p4357_p2)
}
  0x97   : > { %s4361_s25 = scalar_lea.vmem %s4807_s9, 16  ;;  %s4517_s5 = smov [#allocation2]  }
  0x98   : > { %p4362_p1 = scmp.ne.s32.totalorder %s4807_s9, %s4361_s25  ;;  %s4366_s0 = sshll.u32 %s4517_s5, 4  ;;  %s4367_s0 = int_to_ptr.vmem [resolvable:$false] %s4366_s0 }
  0x99   : > { %s4368_s29 = scalar_lea.vmem %s4367_s0, 32  ;;  %p4369_p3 = scmp.lt.s32.totalorder %s4807_s9, %s4367_s0 }
  0x9a   : > { %p4364_p4 = pnand %p4362_p1, %p4348_p0  ;;  %p4370_p7 = scmp.lt.s32.totalorder %s4368_s29, %s4361_s25 }
  0x9c   : > { %p4365_p8 = pneg %p4364_p4  ;;  %p4371_p10 = por %p4370_p7, %p4369_p3 }
  0x9e   : > { %p4372_p13 = pnand %p4371_p10, %p4365_p8 }
  0xa0   : > { %4375 = shalt.err (!%p4372_p13)
}
  0xa1   : > { %4106 = dma.hbm_to_vmem [thread:$0]  (!%p4809_p11), %s4805_s4, 16, %s4807_s9, %s734_s20  }
  0xa2   : > { %p5497_p5 = scmp.ne.s32.totalorder %s5487_s8, 0 }
  0xa3   : > { %s4841_s28 = sand.u32 (!%p5497_p5), 1, %s4502_s2   ;;  %p5498_p0 = scmp.ne.s32.totalorder (!%p5497_p5), %s5484_s26, 0 }
  0xa4   : > { %752 = sbr.rel (%p5497_p5) target bundleno = 4630 (0x1216), region = 112  ;;  %s755_s3 = scalar_lea.sflag (!%p5497_p5), [#allocation3], %s4841_s28 }
  0xa5   : > { %s757_s23 = scalar_lea.vmem (!%p5497_p5), [#allocation2], %s4841_s28 }
  0xab   : > { %4477 = dma.done.wait (%p5498_p0), %s755_s3, 16  }
  0xac   : > { %4479 = vsyncadd (%p5498_p0), %s755_s3, 4294967280  ;;  %p5499_p9 = scmp.eq.s32.totalorder %s4677_s7, 0 }
  0xae   : > { %4481 = dma.done.wait (%p5499_p9), [#allocation6], 2064   ;;  %p5500_p11 = pmov %p5499_p9 }
  0xaf   : > { %p5501_p12 = pmov %p5499_p9 }
  0xb0   : > { %4483 = vsyncadd (%p5500_p11), [#allocation6], 4294965232 }
  0xb1   : > { %4485 = dma.done.wait (%p5501_p12), [#allocation9], 16   ;;  %p5502_p2 = pmov %p5499_p9 }
  0xb2   : > { %p848_p1 = scmp.lt.s32.totalorder %s4677_s7, 1  ;;  %v4518_v0 = vmov 0.0   ;;  %vm4519_vm0 = vmmov 0   ;;  %s5503_s19 = sld [smem:[#allocation21_spill]]  ;;  %vm875_vm1 = vcmask 1045504   ;;  %vm871_vm2 = vcmask 97280  }
  0xb3   : > { %4487 = vsyncadd (%p5502_p2), [#allocation9], 4294967280  ;;  %3793 = vmatprep.subr.bf16.mxu0 %v4518_v0  ;;  %3795 = vmatprep.mubr.msk.bf16.mxu0 %vm4519_vm0, %v4518_v0  ;;  %s5504_s0 = sld [smem:[#allocation23_spill]]  ;;  %v938_v22 = vlaneseq  ;;  %vm961_vm7 = vcmask 130048   ;;  %s5506_s9 = sld [smem:[#allocation25_spill]] }
  0xb4   : > { %s849_s26 = scalar_select %p848_p1, %s4677_s7, 1  ;;  %3799 = vmatprep.subr.bf16.mxu1 %v4518_v0  ;;  %3801 = vmatprep.mubr.msk.bf16.mxu1 %vm4519_vm0, %v4518_v0 }
  0xb5   : > { %v4877_v24 = vshrl.u32 %v938_v22, 7  ;;  %v4879_v25 = vand.u32 127, %v938_v22  ;;  %s5507_s3 = sld [smem:[#allocation29_spill]]  ;;  %s5508_s4 = sld [smem:[#allocation28_spill]] }
  0xb6   : > { %s3702_s8 = sshll.u32 %s849_s26, 4  ;;  %s5505_s26 = sld [smem:[#allocation24_spill]] }
  0xb7   : > { %v940_v26 = vadd.s32 8, %v4877_v24  ;;  %v943_v27 = vadd.s32 1, %v4879_v25  ;;  %v951_v30 = vadd.s32 1, %v4877_v24  ;;  %s5509_s25 = sld [smem:[#allocation27_spill]]  ;;  %vm1528_vm8 = vcmp.ge.s32.totalorder %v4879_v25, 2  ;;  %s5519_s12 = sld [smem:[#allocation33_spill]] }
  0xb8   : > { %s852_s20 = scalar_lea.vmem %s5503_s19, %s3702_s8  ;;  %vm1529_vm9 = vcmp.lt.s32.totalorder %v4879_v25, 4  ;;  %vm1397_vm10 = vcmp.lt.s32.totalorder %v4879_v25, 2  ;;  %vm1811_vm12 = vcmp.ge.s32.totalorder %v4879_v25, 4  ;;  %vm1812_vm13 = vcmp.lt.s32.totalorder %v4879_v25, 6  ;;  %s5520_s15 = sld [smem:[#allocation36_spill]] }
  0xb9   : > { %v4167_v1 = vld [vmem:[%s5504_s0] sm:$0x3f]   ;;  %v855_v3 = vld [vmem:[%s852_s20 + $0x8] sm:$0xff]  ;;  %v952_v29 = vadd.s32 1, %v940_v26  ;;  %vm944_vm3 = vcmp.eq.s32.totalorder %v4877_v24, %v943_v27  ;;  %vm945_vm4 = vcmp.eq.s32.totalorder %v940_v26, %v943_v27  ;;  %vm953_vm5 = vcmp.eq.s32.totalorder %v951_v30, %v4879_v25  ;;  %v4170_v47 = vld [vmem:[%s5506_s9 + $0x10] sm:$0xff]   ;;  %s5521_s13 = sld [smem:[#allocation34_spill]] }
  0xba   : > { %v854_v2 = vld [vmem:[%s852_s20] sm:$0xff]  ;;  %v877_v4 = vsel %vm875_vm1, %v4167_v1, 0  ;;  %v3601_v36 = vsel %vm944_vm3, 1.0, %v4518_v0  ;;  %v3602_v37 = vsel %vm945_vm4, 1.0, %v4518_v0  ;;  %v3603_v40 = vsel %vm953_vm5, 1.0, %v4518_v0  ;;  %v4168_v45 = vld [vmem:[%s5506_s9 + $0x8] sm:$0xff]   ;;  %vm1530_vm11 = vmand %vm1528_vm8, %vm1529_vm9 }
  0xbb   : > { %v858_v5 = vpack.c.bf16 %v855_v3, %v854_v2  ;;  %3794 = vmatpush3.bf16.msra.mxu0 %v877_v4  ;;  %vm954_vm6 = vcmp.eq.s32.totalorder %v952_v29, %v4879_v25  ;;  %v950_v43 = vpack.c.bf16 %v3602_v37, %v3601_v36  ;;  %v4169_v46 = vld [vmem:[%s5506_s9] sm:$0xff]   ;;  %vm2219_vm14 = vcmp.ge.s32.totalorder %v4879_v25, 8  ;;  %vm4958_vm3 = vmand %vm1811_vm12, %vm1812_vm13  ;;  %s5522_s14 = sld [smem:[#allocation35_spill]]  ;;  %s3595_s8 = sshll.u32 %s4841_s28, 4 }
  0xbc   : > { %3805 = vmatprep.subr.bf16.mxu0 %v4518_v0  ;;  %v3598_v6 = vld [vmem:[%s5505_s26] ss:$0 sm:$0xff]  ;;  %v3604_v41 = vsel %vm954_vm6, 1.0, %v4518_v0  ;;  %s5510_s26 = sld [smem:[#allocation30_spill]]  ;;  %vm2220_vm15 = vcmp.lt.s32.totalorder %v4879_v25, 10  ;;  %vm2423_vm1 = vcmp.ge.s32.totalorder %v4879_v25, 10 }
  0xbd   : > { %v959_v44 = vpack.c.bf16 %v3604_v41, %v3603_v40  ;;  %v4171_v62 = vld [vmem:[%s5507_s3] sm:$0xff]   ;;  %v1240_v36 = vld [vmem:[%s5509_s25 + $0x8] sm:$0xff]  ;;  %vm4964_vm4 = vmand %vm2219_vm14, %vm2220_vm15  ;;  %vm2627_vm5 = vcmp.ge.s32.totalorder %v4879_v25, 12  ;;  %vm2628_vm6 = vcmp.lt.s32.totalorder %v4879_v25, 14  ;;  %vm2015_vm9 = vcmp.ge.s32.totalorder %v4879_v25, 6  ;;  %s5524_s20 = sld [smem:[#allocation38_spill]] }
  0xbe   : > { %3796 = vmatmul.mubr.msk.bf16.vlgmr.msra.gmra.mrb[0].mxu0 %vm871_vm2, %v858_v5  ;;  %v4172_v63 = vld [vmem:[%s5508_s4] sm:$0xff]   ;;  %vm2424_vm2 = vcmp.lt.s32.totalorder %v4879_v25, 12  ;;  %vm2831_vm12 = vcmp.ge.s32.totalorder %v4879_v25, 14  ;;  %vm2832_vm13 = vcmp.lt.s32.totalorder %v4879_v25, 16  ;;  %vm2629_vm14 = vmand %vm2627_vm5, %vm2628_vm6  ;;  %s5291_s5 = scalar_lea.vmem [#allocation10], %s3595_s8  ;;  %s841_s0 = scalar_lea.vmem [#allocation11], %s4841_s28 }
  0xbf   : > { %3807 = vmatprep.mubr.msk.bf16.mxu0 %vm4519_vm0, %v4518_v0  ;;  %vm4972_vm8 = vmand %vm2423_vm1, %vm2424_vm2  ;;  %s3377_s29 = sand.u32 1, %s4677_s7   ;;  %s5459_s3 = sshll.u32 %s4677_s7, 4 }
  0xc0   : > { %vm2833_vm1 = vmand %vm2831_vm12, %vm2832_vm13  ;;  %s5525_s8 = sld [smem:[#allocation41_spill]]  ;;  %s3410_s19 = sshll.u32 %s841_s0, 4  ;;  %s3411_s19 = int_to_ptr.vmem [resolvable:$true] %s3410_s19 }
  0xc1   : > { %s4376_s9 = scalar_lea.vmem %s3411_s19, 16  ;;  %s4521_s10 = smov [#allocation11]  }
  0xc2   : > { %v4173_v40 = vld [vmem:[%s5510_s26] sm:$0xff]   ;;  %p4377_p4 = scmp.ne.s32.totalorder %s3411_s19, %s4376_s9  ;;  %s4380_s11 = sshll.u32 %s4521_s10, 4  ;;  %s4381_s11 = int_to_ptr.vmem [resolvable:$false] %s4380_s11 }
  0xc3   : > { %p4383_p7 = scmp.lt.s32.totalorder %s3411_s19, %s4381_s11 }
  0xc4   : > { %p4378_p8 = pnand %p4377_p4, %p4796_p6 }
  0xc6   : > { %s5308_s4 = scalar_lea.hbm %s5525_s8, %s5459_s3  ;;  %p4379_p3 = pneg %p4378_p8 }
 0x191   : > { %v913_v7 = vpop.f32.mrb[0].mxu0 }
 0x192   : > { %v914_v8 = vadd.f32 %v3598_v6, %v913_v7  ;;  %v3797_v9 = vpop.f32.mrb[1].mxu0 }
 0x193   : > { %v916_v10 = vpop.f32.mrb[2].mxu0 }
 0x194   : > { %v920_v11 = vmul.f32 %v914_v8, %v914_v8  ;;  %v917_v12 = vadd.f32 %v3598_v6, %v916_v10  ;;  %v3798_v13 = vpop.f32.mrb[3].mxu0  ;;  %v3617_v6 = vld [vmem:[#allocation5] ss:$0 sm:$0xff] }
 0x196   : > { %v922_v14 = vmul.f32 %v920_v11, %v914_v8  ;;  %v921_v15 = vmul.f32 %v917_v12, %v917_v12 }
 0x198   : > { %v924_v16 = vmul.f32 0.044715, %v922_v14  ;;  %v923_v17 = vmul.f32 %v921_v15, %v917_v12 }
 0x19a   : > { %v926_v18 = vadd.f32 %v924_v16, %v914_v8  ;;  %v925_v19 = vmul.f32 0.044715, %v923_v17 }
 0x19c   : > { %v928_v20 = vmul.f32 0.7978846, %v926_v18  ;;  %v927_v21 = vadd.f32 %v925_v19, %v917_v12 }
 0x19e   : > { %4178 = vtanh.f32 %v928_v20  ;;  %v929_v23 = vmul.f32 0.7978846, %v927_v21 }
 0x1a0   : > { %4180 = vtanh.f32 %v929_v23 }
 0x1a8   : > { %v4179_v28 = vpop.eup %4178 }
 0x1a9   : > { %v932_v31 = vadd.f32 1.0, %v4179_v28 }
 0x1aa   : > { %v4181_v32 = vpop.eup %4180 }
 0x1ab   : > { %v933_v33 = vadd.f32 1.0, %v4181_v32  ;;  %v934_v34 = vmul.f32 0.5, %v932_v31 }
 0x1ad   : > { %v935_v35 = vmul.f32 0.5, %v933_v33  ;;  %v936_v38 = vmul.f32 %v934_v34, %v914_v8 }
 0x1af   : > { %v937_v39 = vmul.f32 %v935_v35, %v917_v12  ;;  %v1239_v35 = vld [vmem:[%s5509_s25] sm:$0xff] }
 0x1b1   : > { %v960_v42 = vpack.c.bf16 %v937_v39, %v936_v38 }
 0x1b3   : > { %3800 = vmatpush3.bf16.msra.mxu1 %v960_v42  ;;  %3806 = vmatpush3.bf16.msra.mxu0 %v960_v42 }
 0x1b4   : > { %3811 = vmatprep.subr.bf16.mxu1 %v4518_v0  ;;  %3817 = vmatprep.subr.bf16.mxu0 %v4518_v0 }
 0x1b6   : > { %3802 = vmatmul.mubr.msk.bf16.vlgmr.msra.gmra.mrb[0].mxu1 %vm961_vm7, %v950_v43  ;;  %3808 = vmatmul.mubr.msk.bf16.vlgmr.msra.gmra.mrb[4].mxu0 %vm961_vm7, %v959_v44  ;;  %v3629_v43 = vsel %vm1530_vm11, 1.0, %v4518_v0  ;;  %vm4982_vm11 = vmpackc.low %vm961_vm7, %vm961_vm7  ;;  %v1495_v44 = vsub.s32 0, %v4877_v24 }
 0x1b7   : > { %3812 = vmatpush3.bf16.msra.mxu1 %v4168_v45  ;;  %3813 = vmatprep.mubr.msk.bf16.mxu1 %vm4519_vm0, %v4518_v0 }
 0x1b8   : > { %3823 = vmatprep.subr.bf16.mxu1 %v4518_v0  ;;  %3819 = vmatprep.mubr.msk.bf16.mxu0 %vm4519_vm0, %v4518_v0 }
 0x1b9   : > { %3818 = vmatpush3.bf16.msra.mxu0 %v4169_v46 }
 0x1ba   : > { %3829 = vmatprep.subr.bf16.mxu0 %v4518_v0 }
 0x1be   : > { %3814 = vmatmul.mubr.msk.bf16.vlgmr.msra.gmra.mrb[4].mxu1 %vm961_vm7, %v960_v42  ;;  %v3624_v42 = vsel %vm1397_vm10, 1.0, %v4518_v0  ;;  %vm2016_vm10 = vcmp.lt.s32.totalorder %v4879_v25, 8  ;;  %v3652_v25 = vsel %vm4964_vm4, 1.0, %v4518_v0  ;;  %vm3315_vm4 = vcmask 122880  }
 0x1bf   : > { %3825 = vmatprep.mubr.msk.bf16.mxu1 %vm4519_vm0, %v4518_v0  ;;  %3824 = vmatpush3.bf16.msra.mxu1 %v4170_v47  ;;  %vm2017_vm15 = vmand %vm2015_vm9, %vm2016_vm10 }
 0x1c0   : > { %3835 = vmatprep.subr.bf16.mxu1 %v4518_v0 }
 0x289   : > { %v999_v48 = vpop.f32.mrb[0].mxu1  ;;  %v1043_v49 = vpop.f32.mrb[4].mxu0 }
 0x28a   : > { %v3803_v50 = vpop.f32.mrb[1].mxu1  ;;  %v3809_v51 = vpop.f32.mrb[5].mxu0 }
 0x28b   : > { %v1002_v52 = vpop.f32.mrb[2].mxu1  ;;  %v1046_v53 = vpop.f32.mrb[6].mxu0 }
 0x28c   : > { %v1052_v54 = vpack.c.bf16 %v1002_v52, %v999_v48  ;;  %v1159_v55 = vpack.c.bf16 %v1046_v53, %v1043_v49  ;;  %v3804_v56 = vpop.f32.mrb[3].mxu1  ;;  %v3810_v57 = vpop.f32.mrb[7].mxu0 }
 0x28e   : > { %3820 = vmatmul.mubr.msk.bf16.vlgmr.msra.gmra.mrb[8].mxu0 %vm961_vm7, %v1052_v54  ;;  %3826 = vmatmul.mubr.msk.bf16.vlgmr.msra.gmra.mrb[8].mxu1 %vm961_vm7, %v1159_v55 }
 0x28f   : > { %3831 = vmatprep.mubr.msk.bf16.mxu0 %vm4519_vm0, %v4518_v0  ;;  %3837 = vmatprep.mubr.msk.bf16.mxu1 %vm4519_vm0, %v4518_v0 }
 0x290   : > { %3836 = vmatpush3.bf16.msra.mxu1 %v4171_v62  ;;  %3830 = vmatpush3.bf16.msra.mxu0 %v4172_v63  ;;  %v5022_v62 = vsel %vm2017_vm15, 1.0, %v4518_v0 }
 0x291   : > { %v1099_v58 = vpop.f32.mrb[4].mxu1  ;;  %3841 = vmatprep.subr.bf16.mxu0 %v4518_v0 }
 0x292   : > { %v3815_v59 = vpop.f32.mrb[5].mxu1 }
 0x293   : > { %v1102_v60 = vpop.f32.mrb[6].mxu1  ;;  %v3638_v59 = vsel %vm4958_vm3, 1.0, %v4518_v0 }
 0x294   : > { %v3816_v61 = vpop.f32.mrb[7].mxu1 }
 0x295   : > { %v3666_v61 = vsel %vm2629_vm14, 1.0, %v4518_v0 }
 0x361   : > { %v1149_v1 = vpop.f32.mrb[8].mxu0  ;;  %v1203_v2 = vpop.f32.mrb[8].mxu1 }
 0x362   : > { %v1150_v3 = vadd.f32 %v1149_v1, %v1099_v58  ;;  %v3821_v4 = vpop.f32.mrb[9].mxu0  ;;  %v3827_v5 = vpop.f32.mrb[9].mxu1 }
 0x363   : > { %v1152_v7 = vpop.f32.mrb[10].mxu0  ;;  %v1206_v8 = vpop.f32.mrb[10].mxu1  ;;  %v5028_v4 = vsel %vm2833_vm1, 1.0, %v4518_v0 }
 0x364   : > { %v1210_v9 = vadd.f32 %v1203_v2, %v1150_v3  ;;  %v1153_v10 = vadd.f32 %v1152_v7, %v1102_v60  ;;  %v3822_v11 = vpop.f32.mrb[11].mxu0  ;;  %v3828_v12 = vpop.f32.mrb[11].mxu1  ;;  %v3659_v60 = vsel %vm4972_vm8, 1.0, %v4518_v0 }
 0x366   : > { %v1219_v13 = vadd.f32 %v3617_v6, %v1210_v9  ;;  %v1211_v14 = vadd.f32 %v1206_v8, %v1153_v10 }
 0x368   : > { %v1221_v15 = vmul.f32 %v1219_v13, %v1219_v13  ;;  %v1220_v16 = vadd.f32 %v3617_v6, %v1211_v14 }
 0x36a   : > { %v1223_v17 = vmul.f32 %v1221_v15, %v1219_v13  ;;  %v1222_v18 = vmul.f32 %v1220_v16, %v1220_v16 }
 0x36c   : > { %v1225_v19 = vmul.f32 0.044715, %v1223_v17  ;;  %v1224_v20 = vmul.f32 %v1222_v18, %v1220_v16 }
 0x36e   : > { %v1227_v21 = vadd.f32 %v1225_v19, %v1219_v13  ;;  %v1226_v22 = vmul.f32 0.044715, %v1224_v20 }
 0x370   : > { %v1229_v23 = vmul.f32 0.7978846, %v1227_v21  ;;  %v1228_v26 = vadd.f32 %v1226_v22, %v1220_v16 }
 0x372   : > { %4182 = vtanh.f32 %v1229_v23  ;;  %v1230_v27 = vmul.f32 0.7978846, %v1228_v26 }
 0x374   : > { %4184 = vtanh.f32 %v1230_v27 }
 0x37c   : > { %v4183_v28 = vpop.eup %4182 }
 0x37d   : > { %v1233_v29 = vadd.f32 1.0, %v4183_v28 }
 0x37e   : > { %v4185_v30 = vpop.eup %4184 }
 0x37f   : > { %v1235_v31 = vmul.f32 0.5, %v1233_v29  ;;  %v1234_v32 = vadd.f32 1.0, %v4185_v30 }
 0x381   : > { %v4927_v33 = vmul.f32 %v1235_v31, %v1219_v13  ;;  %v1236_v34 = vmul.f32 0.5, %v1234_v32 }
 0x383   : > { %v4935_v37 = vmul.f32 %v1236_v34, %v1220_v16  ;;  %v1241_v38 = vadd.f32 %v1239_v35, %v4927_v33 }
 0x385   : > { %v1242_v39 = vadd.f32 %v1240_v36, %v4935_v37 }
 0x387   : > { %v1243_v41 = vpack.c.bf16 %v1242_v39, %v1241_v38 }
 0x389   : > { %3832 = vmatmul.mubr.msk.bf16.vlgmr.msra.gmra.mrb[12].mxu0 %vm961_vm7, %v1243_v41  ;;  %3838 = vmatmul.mubr.msk.bf16.vlgmr.msra.gmra.mrb[12].mxu1 %vm961_vm7, %v1243_v41 }
 0x38a   : > { %3842 = vmatpush3.bf16.msra.mxu0 %v4173_v40  ;;  %3843 = vmatprep.mubr.msk.bf16.mxu0 %vm4519_vm0, %v4518_v0 }
 0x391   : > { %3844 = vmatmul.mubr.msk.bf16.vlgmr.msra.gmra.mrb[16].mxu0 %vm961_vm7, %v1243_v41 }
 0x45c   : > { %v4962_v45 = vpop.f32.mrb[12].mxu0  ;;  %v1338_v46 = vpop.f32.mrb[12].mxu1 }
 0x45d   : > { %v3833_v48 = vpop.f32.mrb[13].mxu0  ;;  %v3839_v49 = vpop.f32.mrb[13].mxu1  ;;  %v1401_v50 = vmul.f32 %v3624_v42, %v4962_v45  ;;  %v1533_v51 = vmul.f32 %v3629_v43, %v4962_v45  ;;  %v1816_v3 = vmul.f32 %v3638_v59, %v4962_v45  ;;  %v2224_v36 = vmul.f32 %v3652_v25, %v4962_v45 }
 0x45e   : > { %v4978_v53 = vpop.f32.mrb[14].mxu0  ;;  %v1341_v54 = vpop.f32.mrb[14].mxu1  ;;  %v2428_v39 = vmul.f32 %v3659_v60, %v4962_v45  ;;  %v2632_v41 = vmul.f32 %v3666_v61, %v4962_v45 }
 0x45f   : > { %v4988_v56 = vpack.c.bf16 %v1341_v54, %v1338_v46  ;;  %v3834_v57 = vpop.f32.mrb[15].mxu0  ;;  %v3840_v58 = vpop.f32.mrb[15].mxu1  ;;  %3851 = vmatprep.mubr.msk.f32.mxu1 %vm961_vm7, %v1401_v50  ;;  %3858 = vmatprep.mubr.msk.f32.mxu0 %vm961_vm7, %v1533_v51  ;;  %v1402_v1 = vmul.f32 %v3624_v42, %v4978_v53  ;;  %v1534_v2 = vmul.f32 %v3629_v43, %v4978_v53  ;;  %v4520_v46 = vmov 0  }
 0x460   : > { %v1817_v35 = vmul.f32 %v3638_v59, %v4978_v53  ;;  %v2225_v38 = vmul.f32 %v3652_v25, %v4978_v53  ;;  %v2429_v40 = vmul.f32 %v3659_v60, %v4978_v53 }
 0x461   : > { %3981 = vmatprep.subr.msk.bf16.mxu1 %vm4982_vm11, %v4988_v56  ;;  %3987 = vmatprep.subr.msk.bf16.mxu0 %vm4982_vm11, %v4988_v56 }
 0x462   : > { %3984 = vmatpush3.bf16.xpose.msk.msra.mxu1 %vm4982_vm11, %v4988_v56  ;;  %3990 = vmatpush3.bf16.xpose.msk.msra.mxu0 %vm4982_vm11, %v4988_v56 }
 0x463   : > { %4001 = vmatprep.subr.msk.bf16.mxu0 %vm4982_vm11, %v4988_v56 }
 0x464   : > { %v1387_v63 = vpop.f32.mrb[16].mxu0 }
 0x465   : > { %v3845_v5 = vpop.f32.mrb[17].mxu0  ;;  %v1647_v6 = vmul.f32 %v3629_v43, %v1387_v63  ;;  %v1526_v7 = vmul.f32 %v3624_v42, %v1387_v63  ;;  %v1930_v8 = vmul.f32 %v3638_v59, %v1387_v63  ;;  %v2134_v9 = vmul.f32 %v5022_v62, %v1387_v63 }
 0x466   : > { %v1390_v10 = vpop.f32.mrb[18].mxu0  ;;  %v2338_v11 = vmul.f32 %v3652_v25, %v1387_v63  ;;  %v2542_v12 = vmul.f32 %v3659_v60, %v1387_v63  ;;  %v2746_v13 = vmul.f32 %v3666_v61, %v1387_v63  ;;  %v2950_v14 = vmul.f32 %v5028_v4, %v1387_v63 }
 0x467   : > { %v3846_v15 = vpop.f32.mrb[19].mxu0  ;;  %v1648_v16 = vmul.f32 %v3629_v43, %v1390_v10  ;;  %v1527_v17 = vmul.f32 %v3624_v42, %v1390_v10  ;;  %v1931_v18 = vmul.f32 %v3638_v59, %v1390_v10  ;;  %v2135_v19 = vmul.f32 %v5022_v62, %v1390_v10  ;;  %v1394_v43 = vld [vmem:[%s757_s23] sm:$0x1]  ;;  %s5523_s23 = sld [smem:[#allocation37_spill]] }
 0x468   : > { %v2339_v20 = vmul.f32 %v3652_v25, %v1390_v10  ;;  %v2543_v21 = vmul.f32 %v3659_v60, %v1390_v10  ;;  %v2747_v22 = vmul.f32 %v3666_v61, %v1390_v10  ;;  %v2951_v23 = vmul.f32 %v5028_v4, %v1390_v10 }
 0x469   : > { %3852 = vmatmul.mubr.msk.f32.vlgmr.msra.gmra.mrb[16].mxu1 %vm961_vm7, %v1402_v1  ;;  %3859 = vmatmul.mubr.msk.f32.vlgmr.msra.gmra.mrb[20].mxu0 %vm961_vm7, %v1534_v2  ;;  %v3991_v26 = vpack.c.bf16 %v1648_v16, %v1647_v6  ;;  %v5036_v27 = vpack.c.bf16 %v1527_v17, %v1526_v7  ;;  %v5038_v28 = vpack.c.bf16 %v1931_v18, %v1930_v8  ;;  %vm1395_vm2 = vcmp.eq.f32.partialorder %v1394_v43, 0.0 }
 0x46a   : > { %4004 = vmatpush3.bf16.xpose.msk.msra.mxu0 %vm4982_vm11, %v4988_v56  ;;  %3879 = vmatprep.mubr.msk.f32.mxu0 %vm961_vm7, %v1816_v3  ;;  %v5044_v29 = vpack.c.bf16 %v2135_v19, %v2134_v9  ;;  %v5046_v30 = vpack.c.bf16 %v2339_v20, %v2338_v11  ;;  %v5048_v31 = vpack.c.bf16 %v2543_v21, %v2542_v12  ;;  %v1492_v47 = vsel %vm1395_vm2, 1, %v4520_v46 }
 0x46b   : > { %3992 = vmatprep.subr.bf16.mxu1 %v3991_v26  ;;  %4021 = vmatprep.subr.msk.bf16.mxu0 %vm4982_vm11, %v4988_v56  ;;  %v5053_v32 = vpack.c.bf16 %v2747_v22, %v2746_v13  ;;  %v5055_v34 = vpack.c.bf16 %v2951_v23, %v2950_v14  ;;  %v2633_v42 = vmul.f32 %v3666_v61, %v4978_v53 }
 0x46c   : > { %3994 = vmatpush3.bf16.msra.mxu1 %v3991_v26  ;;  %v5093_v48 = vrot.slane %v1492_v47, %v1495_v44 }
 0x46d   : > { %3996 = vmatprep.subr.bf16.mxu1 %v5036_v27 }
 0x46e   : > { %vm1497_vm3 = vcmp.eq.s32.totalorder %v5093_v48, 1 }
 0x471   : > { %3880 = vmatmul.mubr.msk.f32.vlgmr.msra.gmra.mrb[22].mxu0 %vm961_vm7, %v1817_v35 }
 0x472   : > { %4024 = vmatpush3.bf16.xpose.msk.msra.mxu0 %vm4982_vm11, %v4988_v56  ;;  %3907 = vmatprep.mubr.msk.f32.mxu0 %vm961_vm7, %v2224_v36 }
 0x473   : > { %4031 = vmatprep.subr.msk.bf16.mxu0 %vm4982_vm11, %v4988_v56 }
 0x479   : > { %3908 = vmatmul.mubr.msk.f32.vlgmr.msra.gmra.mrb[24].mxu0 %vm961_vm7, %v2225_v38 }
 0x47a   : > { %4034 = vmatpush3.bf16.xpose.msk.msra.mxu0 %vm4982_vm11, %v4988_v56  ;;  %3921 = vmatprep.mubr.msk.f32.mxu0 %vm961_vm7, %v2428_v39 }
 0x47b   : > { %4041 = vmatprep.subr.msk.bf16.mxu0 %vm4982_vm11, %v4988_v56 }
 0x481   : > { %3922 = vmatmul.mubr.msk.f32.vlgmr.msra.gmra.mrb[26].mxu0 %vm961_vm7, %v2429_v40 }
 0x482   : > { %4044 = vmatpush3.bf16.xpose.msk.msra.mxu0 %vm4982_vm11, %v4988_v56  ;;  %3935 = vmatprep.mubr.msk.f32.mxu0 %vm961_vm7, %v2632_v41 }
 0x483   : > { %3959 = vmatprep.subr.bf16.mxu0 %v4518_v0 }
 0x489   : > { %3936 = vmatmul.mubr.msk.f32.vlgmr.msra.gmra.mrb[28].mxu0 %vm961_vm7, %v2633_v42 }
 0x48a   : > { %3961 = vmatprep.mubr.msk.bf16.mxu0 %vm4519_vm0, %v4518_v0 }
 0x53c   : > { %v3853_v49 = vpop.f32.mrb[16].mxu1  ;;  %v3860_v50 = vpop.f32.mrb[20].mxu0 }
 0x53d   : > { %v1481_v51 = vpop.f32.mrb[17].mxu1  ;;  %v1607_v52 = vpop.f32.mrb[21].mxu0  ;;  %v1491_v54 = vmul.f32 0.25, %v3853_v49  ;;  %v1617_v57 = vmul.f32 0.25, %v3860_v50 }
 0x53e   : > { %v1490_v58 = vmul.f32 0.25, %v1481_v51  ;;  %v1616_v59 = vmul.f32 0.25, %v1607_v52 }
 0x53f   : > { %v1499_v63 = vsel %vm1497_vm3, -10000.0, %v1491_v54  ;;  %v1619_v1 = vsel %vm1497_vm3, -10000.0, %v1617_v57 }
 0x540   : > { %v1498_v25 = vsel %vm1497_vm3, -10000.0, %v1490_v58  ;;  %v1618_v24 = vsel %vm1497_vm3, -10000.0, %v1616_v59  ;;  %v1503_v6 = vsel %vm961_vm7, %v1499_v63, -inf  ;;  %v1623_v7 = vsel %vm961_vm7, %v1619_v1, -inf }
 0x541   : > { %v1500_v60 = vsel %vm961_vm7, %v1498_v25, -inf  ;;  %v1620_v61 = vsel %vm961_vm7, %v1618_v24, -inf }
 0x542   : > { %1501 = vmax.xlane.f32.xlu1 %v1500_v60  ;;  %1621 = vmax.xlane.f32.xlu0 %v1620_v61 }
 0x544   : > { %v3881_v2 = vpop.f32.mrb[22].mxu0 }
 0x545   : > { %v1900_v3 = vmul.f32 0.25, %v3881_v2  ;;  %v1890_v5 = vpop.f32.mrb[23].mxu0 }
 0x546   : > { %v1899_v8 = vmul.f32 0.25, %v1890_v5  ;;  %1504 = vmax.xlane.f32.xlu1 %v1503_v6  ;;  %1624 = vmax.xlane.f32.xlu0 %v1623_v7 }
 0x547   : > { %v1902_v9 = vsel %vm1497_vm3, -10000.0, %v1900_v3 }
 0x548   : > { %v1906_v10 = vsel %vm961_vm7, %v1902_v9, -inf  ;;  %v1901_v11 = vsel %vm1497_vm3, -10000.0, %v1899_v8  ;;  %v1643_v8 = vld [vmem:[#allocation7 + $0x10] sm:$0xff] }
 0x549   : > { %v1903_v12 = vsel %vm961_vm7, %v1901_v11, -inf }
 0x54a   : > { %1907 = vmax.xlane.f32.xlu1 %v1906_v10  ;;  %1904 = vmax.xlane.f32.xlu0 %v1903_v12 }
 0x54c   : > { %v5114_v13 = vpop.f32.mrb[24].mxu0 }
 0x54d   : > { %v5116_v14 = vpop.f32.mrb[25].mxu0 }
 0x554   : > { %v5118_v15 = vpop.f32.mrb[26].mxu0 }
 0x555   : > { %v5120_v16 = vpop.f32.mrb[27].mxu0 }
 0x55c   : > { %v5122_v17 = vpop.f32.mrb[28].mxu0 }
 0x55d   : > { %v5124_v18 = vpop.f32.mrb[29].mxu0 }
 0x5cf   : > { %v1502_v19 = vpop.xlane.xlu1 %1501  ;;  %v1622_v20 = vpop.xlane.xlu0 %1621 }
 0x5d0   : > { %v1506_v21 = vsub.f32 %v1498_v25, %v1502_v19  ;;  %v1626_v22 = vsub.f32 %v1618_v24, %v1622_v20  ;;  %v1644_v19 = vld [vmem:[#allocation7 + $0x18] sm:$0xff] }
 0x5d2   : > { %v1628_v23 = vmul.f32 1.442695, %v1626_v22  ;;  %v1508_v26 = vmul.f32 1.442695, %v1506_v21  ;;  %v1522_v22 = vld [vmem:[#allocation7] sm:$0xff] }
 0x5d3   : > { %v1505_v35 = vpop.xlane.xlu1 %1504  ;;  %v1625_v36 = vpop.xlane.xlu0 %1624 }
 0x5d4   : > { %v1507_v38 = vsub.f32 %v1499_v63, %v1505_v35  ;;  %v1627_v39 = vsub.f32 %v1619_v1, %v1625_v36  ;;  %4186 = vpow2.f32 %v1628_v23 }
 0x5d5   : > { %4188 = vpow2.f32 %v1508_v26 }
 0x5d6   : > { %v1630_v40 = vmul.f32 1.442695, %v1627_v39  ;;  %v1510_v41 = vmul.f32 1.442695, %v1507_v38 }
 0x5d7   : > { %v1908_v42 = vpop.xlane.xlu1 %1907  ;;  %v1905_v43 = vpop.xlane.xlu0 %1904 }
 0x5d8   : > { %v1910_v44 = vsub.f32 %v1902_v9, %v1908_v42  ;;  %v1909_v46 = vsub.f32 %v1901_v11, %v1905_v43  ;;  %4190 = vpow2.f32 %v1630_v40  ;;  %v1523_v40 = vld [vmem:[#allocation7 + $0x8] sm:$0xff]  ;;  %v1926_v42 = vld [vmem:[#allocation7 + $0x20] sm:$0xff] }
 0x5d9   : > { %4192 = vpow2.f32 %v1510_v41 }
 0x5da   : > { %v1911_v47 = vmul.f32 1.442695, %v1909_v46  ;;  %v1913_v49 = vmul.f32 1.442695, %v1910_v44 }
 0x5dc   : > { %4194 = vpow2.f32 %v1911_v47 }
 0x5dd   : > { %4196 = vpow2.f32 %v1913_v49 }
 0x5de   : > { %v4187_v50 = vpop.eup %4186 }
 0x5df   : > { %v1632_v51 = vsel %vm961_vm7, %v4187_v50, 0.0  ;;  %v4189_v52 = vpop.eup %4188 }
 0x5e0   : > { %1633 = vadd.xlane.f32.xlu0 %v1632_v51  ;;  %v1512_v57 = vsel %vm961_vm7, %v4189_v52, 0.0 }
 0x5e2   : > { %v4191_v54 = vpop.eup %4190 }
 0x5e3   : > { %v1635_v58 = vsel %vm961_vm7, %v4191_v54, 0.0  ;;  %v4193_v59 = vpop.eup %4192 }
 0x5e4   : > { %1513 = vadd.xlane.f32.xlu0 %v1512_v57  ;;  %1636 = vadd.xlane.f32.xlu1 %v1635_v58  ;;  %v1515_v24 = vsel %vm961_vm7, %v4193_v59, 0.0  ;;  %v2307_v58 = vmul.f32 0.25, %v5116_v14 }
 0x5e6   : > { %v4195_v25 = vpop.eup %4194  ;;  %v2309_v14 = vsel %vm1497_vm3, -10000.0, %v2307_v58 }
 0x5e7   : > { %v1915_v60 = vsel %vm961_vm7, %v4195_v25, 0.0  ;;  %v4197_v61 = vpop.eup %4196 }
 0x5e8   : > { %1516 = vadd.xlane.f32.xlu1 %v1515_v24  ;;  %1916 = vadd.xlane.f32.xlu0 %v1915_v60  ;;  %v1918_v63 = vsel %vm961_vm7, %v4197_v61, 0.0 }
 0x5ec   : > { %1919 = vadd.xlane.f32.xlu1 %v1918_v63 }
 0x66d   : > { %v1634_v1 = vpop.xlane.xlu0 %1633 }
 0x66e   : > { %4198 = vrcp.f32 %v1634_v1  ;;  %v2716_v1 = vmul.f32 0.25, %v5122_v17 }
 0x670   : > { %v2718_v17 = vsel %vm1497_vm3, -10000.0, %v2716_v1 }
 0x671   : > { %v1637_v2 = vpop.xlane.xlu1 %1636  ;;  %v1514_v3 = vpop.xlane.xlu0 %1513 }
 0x672   : > { %4200 = vrcp.f32 %v1637_v2  ;;  %v2311_v2 = vsel %vm961_vm7, %v2309_v14, -inf }
 0x673   : > { %4202 = vrcp.f32 %v1514_v3  ;;  %v2715_v3 = vmul.f32 0.25, %v5124_v18 }
 0x675   : > { %v1517_v5 = vpop.xlane.xlu1 %1516  ;;  %v1917_v6 = vpop.xlane.xlu0 %1916 }
 0x676   : > { %4204 = vrcp.f32 %v1517_v5 }
 0x677   : > { %4206 = vrcp.f32 %v1917_v6 }
 0x678   : > { %v4199_v7 = vpop.eup %4198 }
 0x679   : > { %v1639_v9 = vmul.f32 %v4199_v7, %v4187_v50  ;;  %v1920_v10 = vpop.xlane.xlu1 %1919  ;;  %v2020_v50 = vmul.f32 %v5022_v62, %v4962_v45  ;;  %v2717_v7 = vsel %vm1497_vm3, -10000.0, %v2715_v3 }
 0x67a   : > { %4208 = vrcp.f32 %v1920_v10  ;;  %v2719_v18 = vsel %vm961_vm7, %v2717_v7, -inf }
 0x67b   : > { %v1645_v11 = vadd.f32 %v1643_v8, %v1639_v9  ;;  %v2722_v8 = vsel %vm961_vm7, %v2718_v17, -inf }
 0x67c   : > { %v4201_v12 = vpop.eup %4200 }
 0x67d   : > { %v4203_v20 = vpop.eup %4202  ;;  %v1641_v21 = vmul.f32 %v4201_v12, %v4191_v54  ;;  %3865 = vmatprep.mubr.msk.f32.mxu1 %vm961_vm7, %v1645_v11 }
 0x67e   : > { %v1519_v23 = vmul.f32 %v4203_v20, %v4189_v52  ;;  %v2308_v52 = vmul.f32 0.25, %v5114_v13 }
 0x67f   : > { %v1646_v26 = vadd.f32 %v1644_v19, %v1641_v21 }
 0x680   : > { %v4205_v35 = vpop.eup %4204  ;;  %v1524_v36 = vadd.f32 %v1522_v22, %v1519_v23  ;;  %v2310_v13 = vsel %vm1497_vm3, -10000.0, %v2308_v52 }
 0x681   : > { %v4207_v38 = vpop.eup %4206  ;;  %3866 = vmatmul.mubr.msk.f32.vlgmr.msra.gmra.mrb[18].mxu1 %vm961_vm7, %v1646_v26  ;;  %v1521_v39 = vmul.f32 %v4205_v35, %v4193_v59  ;;  %v2314_v63 = vsel %vm961_vm7, %v2310_v13, -inf }
 0x682   : > { %3998 = vmatpush3.bf16.msra.mxu1 %v5036_v27  ;;  %3872 = vmatprep.mubr.msk.f32.mxu1 %vm961_vm7, %v1524_v36  ;;  %v1922_v41 = vmul.f32 %v4207_v38, %v4195_v25  ;;  %v1927_v27 = vld [vmem:[#allocation7 + $0x28] sm:$0xff] }
 0x683   : > { %4006 = vmatprep.subr.bf16.mxu1 %v5038_v28  ;;  %v1525_v43 = vadd.f32 %v1523_v40, %v1521_v39 }
 0x684   : > { %v4209_v44 = vpop.eup %4208  ;;  %v1928_v46 = vadd.f32 %v1926_v42, %v1922_v41 }
 0x685   : > { %v1924_v47 = vmul.f32 %v4209_v44, %v4197_v61  ;;  %v2511_v61 = vmul.f32 0.25, %v5120_v16 }
 0x687   : > { %v1929_v49 = vadd.f32 %v1927_v27, %v1924_v47  ;;  %v2513_v16 = vsel %vm1497_vm3, -10000.0, %v2511_v61 }
 0x688   : > { %v2515_v6 = vsel %vm961_vm7, %v2513_v16, -inf }
 0x689   : > { %3873 = vmatmul.mubr.msk.f32.vlgmr.msra.gmra.mrb[18].mxu1 %vm961_vm7, %v1525_v43 }
 0x68a   : > { %4008 = vmatpush3.bf16.msra.mxu1 %v5038_v28  ;;  %3886 = vmatprep.mubr.msk.f32.mxu1 %vm961_vm7, %v1928_v46  ;;  %v2021_v28 = vmul.f32 %v5022_v62, %v4978_v53 }
 0x68b   : > { %4011 = vmatprep.subr.msk.bf16.mxu1 %vm4982_vm11, %v4988_v56 }
 0x691   : > { %3887 = vmatmul.mubr.msk.f32.vlgmr.msra.gmra.mrb[18].mxu1 %vm961_vm7, %v1929_v49 }
 0x692   : > { %3893 = vmatprep.mubr.msk.f32.mxu1 %vm961_vm7, %v2020_v50 }
 0x693   : > { %4014 = vmatpush3.bf16.xpose.msk.msra.mxu1 %vm4982_vm11, %v4988_v56 }
 0x694   : > { %4016 = vmatprep.subr.bf16.mxu1 %v5044_v29 }
 0x69a   : > { %3894 = vmatmul.mubr.msk.f32.vlgmr.msra.gmra.mrb[20].mxu1 %vm961_vm7, %v2021_v28 }
 0x69b   : > { %4018 = vmatpush3.bf16.msra.mxu1 %v5044_v29  ;;  %v2512_v29 = vmul.f32 0.25, %v5118_v15 }
 0x69c   : > { %4026 = vmatprep.subr.bf16.mxu1 %v5046_v30 }
 0x69d   : > { %v2514_v15 = vsel %vm1497_vm3, -10000.0, %v2512_v29 }
 0x69e   : > { %v2518_v5 = vsel %vm961_vm7, %v2514_v15, -inf }
 0x76d   : > { %v3895_v51 = vpop.f32.mrb[20].mxu1 }
 0x76e   : > { %v2104_v54 = vmul.f32 0.25, %v3895_v51  ;;  %v2094_v57 = vpop.f32.mrb[21].mxu1 }
 0x76f   : > { %v2103_v59 = vmul.f32 0.25, %v2094_v57 }
 0x770   : > { %v2106_v25 = vsel %vm1497_vm3, -10000.0, %v2104_v54 }
 0x771   : > { %v2110_v24 = vsel %vm961_vm7, %v2106_v25, -inf  ;;  %v2105_v62 = vsel %vm1497_vm3, -10000.0, %v2103_v59 }
 0x772   : > { %2111 = vmax.xlane.f32.xlu1 %v2110_v24  ;;  %v2107_v60 = vsel %vm961_vm7, %v2105_v62, -inf }
 0x773   : > { %2108 = vmax.xlane.f32.xlu0 %v2107_v60 }
 0x776   : > { %2315 = vmax.xlane.f32.xlu1 %v2314_v63 }
 0x777   : > { %2312 = vmax.xlane.f32.xlu0 %v2311_v2 }
 0x77a   : > { %2519 = vmax.xlane.f32.xlu1 %v2518_v5 }
 0x77b   : > { %2516 = vmax.xlane.f32.xlu0 %v2515_v6 }
 0x77e   : > { %2723 = vmax.xlane.f32.xlu1 %v2722_v8  ;;  %v2130_v8 = vld [vmem:[#allocation7 + $0x30] sm:$0xff] }
 0x77f   : > { %2720 = vmax.xlane.f32.xlu0 %v2719_v18 }
 0x7ff   : > { %v2112_v9 = vpop.xlane.xlu1 %2111 }
 0x800   : > { %v2114_v10 = vsub.f32 %v2106_v25, %v2112_v9  ;;  %v2109_v11 = vpop.xlane.xlu0 %2108 }
 0x801   : > { %v2113_v12 = vsub.f32 %v2105_v62, %v2109_v11 }
 0x802   : > { %v2117_v19 = vmul.f32 1.442695, %v2114_v10  ;;  %v2131_v10 = vld [vmem:[#allocation7 + $0x38] sm:$0xff] }
 0x803   : > { %v2115_v20 = vmul.f32 1.442695, %v2113_v12  ;;  %v2316_v21 = vpop.xlane.xlu1 %2315 }
 0x804   : > { %4210 = vpow2.f32 %v2117_v19  ;;  %v2318_v22 = vsub.f32 %v2310_v13, %v2316_v21  ;;  %v2313_v23 = vpop.xlane.xlu0 %2312 }
 0x805   : > { %4212 = vpow2.f32 %v2115_v20  ;;  %v2317_v26 = vsub.f32 %v2309_v14, %v2313_v23  ;;  %v2334_v20 = vld [vmem:[#allocation7 + $0x40] sm:$0xff] }
 0x806   : > { %v2321_v35 = vmul.f32 1.442695, %v2318_v22 }
 0x807   : > { %v2319_v36 = vmul.f32 1.442695, %v2317_v26  ;;  %v2520_v38 = vpop.xlane.xlu1 %2519 }
 0x808   : > { %4214 = vpow2.f32 %v2321_v35  ;;  %v2522_v39 = vsub.f32 %v2514_v15, %v2520_v38  ;;  %v2517_v40 = vpop.xlane.xlu0 %2516  ;;  %v2335_v38 = vld [vmem:[#allocation7 + $0x48] sm:$0xff] }
 0x809   : > { %4216 = vpow2.f32 %v2319_v36  ;;  %v2521_v41 = vsub.f32 %v2513_v16, %v2517_v40  ;;  %v2538_v40 = vld [vmem:[#allocation7 + $0x50] sm:$0xff] }
 0x80a   : > { %v2525_v42 = vmul.f32 1.442695, %v2522_v39 }
 0x80b   : > { %v2523_v43 = vmul.f32 1.442695, %v2521_v41  ;;  %v2724_v44 = vpop.xlane.xlu1 %2723 }
 0x80c   : > { %4218 = vpow2.f32 %v2525_v42  ;;  %v2726_v46 = vsub.f32 %v2718_v17, %v2724_v44  ;;  %v2721_v47 = vpop.xlane.xlu0 %2720 }
 0x80d   : > { %4220 = vpow2.f32 %v2523_v43  ;;  %v2725_v27 = vsub.f32 %v2717_v7, %v2721_v47 }
 0x80e   : > { %v4211_v49 = vpop.eup %4210  ;;  %v2729_v50 = vmul.f32 1.442695, %v2726_v46  ;;  %v2539_v46 = vld [vmem:[#allocation7 + $0x58] sm:$0xff] }
 0x80f   : > { %v4213_v28 = vpop.eup %4212  ;;  %v2727_v51 = vmul.f32 1.442695, %v2725_v27  ;;  %v2122_v52 = vsel %vm961_vm7, %v4211_v49, 0.0  ;;  %v2742_v27 = vld [vmem:[#allocation7 + $0x60] sm:$0xff] }
 0x810   : > { %4222 = vpow2.f32 %v2729_v50  ;;  %2123 = vadd.xlane.f32.xlu1 %v2122_v52  ;;  %v2119_v54 = vsel %vm961_vm7, %v4213_v28, 0.0 }
 0x811   : > { %4224 = vpow2.f32 %v2727_v51  ;;  %2120 = vadd.xlane.f32.xlu0 %v2119_v54  ;;  %v2836_v54 = vmul.f32 %v5028_v4, %v4962_v45 }
 0x812   : > { %v4215_v57 = vpop.eup %4214 }
 0x813   : > { %v4217_v58 = vpop.eup %4216  ;;  %v2326_v59 = vsel %vm961_vm7, %v4215_v57, 0.0 }
 0x814   : > { %2327 = vadd.xlane.f32.xlu1 %v2326_v59  ;;  %v2323_v25 = vsel %vm961_vm7, %v4217_v58, 0.0 }
 0x815   : > { %2324 = vadd.xlane.f32.xlu0 %v2323_v25 }
 0x816   : > { %v4219_v24 = vpop.eup %4218 }
 0x817   : > { %v4221_v62 = vpop.eup %4220  ;;  %v2530_v29 = vsel %vm961_vm7, %v4219_v24, 0.0 }
 0x818   : > { %2531 = vadd.xlane.f32.xlu1 %v2530_v29  ;;  %v2527_v60 = vsel %vm961_vm7, %v4221_v62, 0.0 }
 0x819   : > { %2528 = vadd.xlane.f32.xlu0 %v2527_v60 }
 0x81a   : > { %v5192_v13 = vpop.eup %4222 }
 0x81b   : > { %v4225_v61 = vpop.eup %4224  ;;  %v2734_v14 = vsel %vm961_vm7, %v5192_v13, 0.0 }
 0x81c   : > { %2735 = vadd.xlane.f32.xlu1 %v2734_v14  ;;  %v2731_v63 = vsel %vm961_vm7, %v4225_v61, 0.0 }
 0x81d   : > { %2732 = vadd.xlane.f32.xlu0 %v2731_v63 }
 0x89d   : > { %v2124_v1 = vpop.xlane.xlu1 %2123 }
 0x89e   : > { %4226 = vrcp.f32 %v2124_v1  ;;  %v2121_v2 = vpop.xlane.xlu0 %2120 }
 0x89f   : > { %4228 = vrcp.f32 %v2121_v2 }
 0x8a1   : > { %v2328_v15 = vpop.xlane.xlu1 %2327 }
 0x8a2   : > { %v2325_v3 = vpop.xlane.xlu0 %2324 }
 0x8a3   : > { %4230 = vrcp.f32 %v2325_v3 }
 0x8a4   : > { %4232 = vrcp.f32 %v2328_v15 }
 0x8a5   : > { %v2532_v7 = vpop.xlane.xlu1 %2531 }
 0x8a6   : > { %v2529_v16 = vpop.xlane.xlu0 %2528 }
 0x8a7   : > { %4234 = vrcp.f32 %v2529_v16  ;;  %v2946_v16 = vld [vmem:[#allocation7 + $0x70] sm:$0xff] }
 0x8a8   : > { %v4227_v5 = vpop.eup %4226  ;;  %4236 = vrcp.f32 %v2532_v7 }
 0x8a9   : > { %v4229_v6 = vpop.eup %4228  ;;  %v2128_v17 = vmul.f32 %v4227_v5, %v4211_v49  ;;  %v2736_v36 = vpop.xlane.xlu1 %2735 }
 0x8aa   : > { %v2733_v18 = vpop.xlane.xlu0 %2732  ;;  %v2126_v9 = vmul.f32 %v4229_v6, %v4213_v28  ;;  %v2947_v6 = vld [vmem:[#allocation7 + $0x78] sm:$0xff] }
 0x8ab   : > { %4238 = vrcp.f32 %v2733_v18  ;;  %v2133_v19 = vadd.f32 %v2131_v10, %v2128_v17 }
 0x8ac   : > { %v2132_v11 = vadd.f32 %v2130_v8, %v2126_v9  ;;  %4240 = vrcp.f32 %v2736_v36 }
 0x8ad   : > { %v4231_v12 = vpop.eup %4230 }
 0x8ae   : > { %v4233_v21 = vpop.eup %4232  ;;  %3900 = vmatprep.mubr.msk.f32.mxu1 %vm961_vm7, %v2132_v11  ;;  %v2330_v22 = vmul.f32 %v4231_v12, %v4217_v58 }
 0x8af   : > { %3901 = vmatmul.mubr.msk.f32.vlgmr.msra.gmra.mrb[18].mxu1 %vm961_vm7, %v2133_v19  ;;  %v2332_v35 = vmul.f32 %v4233_v21, %v4215_v57 }
 0x8b0   : > { %4028 = vmatpush3.bf16.msra.mxu1 %v5046_v30  ;;  %v2336_v23 = vadd.f32 %v2334_v20, %v2330_v22 }
 0x8b1   : > { %v4235_v26 = vpop.eup %4234  ;;  %4036 = vmatprep.subr.bf16.mxu1 %v5048_v31  ;;  %v2337_v41 = vadd.f32 %v2335_v38, %v2332_v35 }
 0x8b2   : > { %3914 = vmatprep.mubr.msk.f32.mxu1 %vm961_vm7, %v2336_v23  ;;  %v2534_v39 = vmul.f32 %v4235_v26, %v4221_v62  ;;  %v4237_v42 = vpop.eup %4236 }
 0x8b3   : > { %v2536_v30 = vmul.f32 %v4237_v42, %v4219_v24 }
 0x8b4   : > { %v2540_v43 = vadd.f32 %v2538_v40, %v2534_v39 }
 0x8b5   : > { %v4239_v44 = vpop.eup %4238  ;;  %v2541_v49 = vadd.f32 %v2539_v46, %v2536_v30  ;;  %v3680_v30 = vld [vmem:[#allocation8] ss:$0 sm:$0xff] }
 0x8b6   : > { %v2738_v47 = vmul.f32 %v4239_v44, %v4225_v61  ;;  %v4241_v50 = vpop.eup %4240 }
 0x8b7   : > { %3915 = vmatmul.mubr.msk.f32.vlgmr.msra.gmra.mrb[18].mxu1 %vm961_vm7, %v2337_v41  ;;  %v2740_v51 = vmul.f32 %v4241_v50, %v5192_v13 }
 0x8b8   : > { %4038 = vmatpush3.bf16.msra.mxu1 %v5048_v31  ;;  %3928 = vmatprep.mubr.msk.f32.mxu1 %vm961_vm7, %v2540_v43  ;;  %v2744_v28 = vadd.f32 %v2742_v27, %v2738_v47  ;;  %v2743_v31 = vld [vmem:[#allocation7 + $0x68] sm:$0xff]  ;;  %v3681_v27 = vld [vmem:[%s5519_s12] ss:$0 sm:$0xff]  ;;  %s4382_s12 = scalar_lea.vmem %s4381_s11, 32 }
 0x8b9   : > { %4046 = vmatprep.subr.bf16.mxu1 %v5053_v32  ;;  %v2745_v52 = vadd.f32 %v2743_v31, %v2740_v51  ;;  %p4384_p10 = scmp.lt.s32.totalorder %s4382_s12, %s4376_s9 }
 0x8bb   : > { %p4385_p13 = por %p4384_p10, %p4383_p7 }
 0x8bd   : > { %p4386_p5 = pnand %p4385_p13, %p4379_p3 }
 0x8bf   : > { %3929 = vmatmul.mubr.msk.f32.vlgmr.msra.gmra.mrb[18].mxu1 %vm961_vm7, %v2541_v49 }
 0x8c0   : > { %4048 = vmatpush3.bf16.msra.mxu1 %v5053_v32  ;;  %3942 = vmatprep.mubr.msk.f32.mxu1 %vm961_vm7, %v2744_v28  ;;  %v2837_v32 = vmul.f32 %v5028_v4, %v4978_v53 }
 0x8c1   : > { %4051 = vmatprep.subr.msk.bf16.mxu1 %vm4982_vm11, %v4988_v56 }
 0x8c7   : > { %3943 = vmatmul.mubr.msk.f32.vlgmr.msra.gmra.mrb[18].mxu1 %vm961_vm7, %v2745_v52 }
 0x8c8   : > { %3949 = vmatprep.mubr.msk.f32.mxu1 %vm961_vm7, %v2836_v54 }
 0x8c9   : > { %4054 = vmatpush3.bf16.xpose.msk.msra.mxu1 %vm4982_vm11, %v4988_v56 }
 0x8ca   : > { %4056 = vmatprep.subr.bf16.mxu1 %v5055_v34 }
 0x8d0   : > { %3950 = vmatmul.mubr.msk.f32.vlgmr.msra.gmra.mrb[22].mxu1 %vm961_vm7, %v2837_v32 }
 0x8d1   : > { %4058 = vmatpush3.bf16.msra.mxu1 %v5055_v34 }
 0x8d2   : > { %3973 = vmatprep.subr.bf16.mxu1 %v4518_v0 }
 0x9a3   : > { %v3951_v45 = vpop.f32.mrb[22].mxu1 }
 0x9a4   : > { %v2920_v57 = vmul.f32 0.25, %v3951_v45  ;;  %v2910_v58 = vpop.f32.mrb[23].mxu1 }
 0x9a5   : > { %v2919_v59 = vmul.f32 0.25, %v2910_v58 }
 0x9a6   : > { %v2922_v25 = vsel %vm1497_vm3, -10000.0, %v2920_v57 }
 0x9a7   : > { %v2926_v55 = vsel %vm961_vm7, %v2922_v25, -inf  ;;  %v2921_v56 = vsel %vm1497_vm3, -10000.0, %v2919_v59 }
 0x9a8   : > { %2927 = vmax.xlane.f32.xlu1 %v2926_v55  ;;  %v2923_v53 = vsel %vm961_vm7, %v2921_v56, -inf }
 0x9a9   : > { %2924 = vmax.xlane.f32.xlu0 %v2923_v53 }
 0xa35   : > { %v2928_v4 = vpop.xlane.xlu1 %2927 }
 0xa36   : > { %v2930_v34 = vsub.f32 %v2922_v25, %v2928_v4  ;;  %v2925_v24 = vpop.xlane.xlu0 %2924 }
 0xa37   : > { %v2929_v62 = vsub.f32 %v2921_v56, %v2925_v24 }
 0xa38   : > { %v2933_v29 = vmul.f32 1.442695, %v2930_v34 }
 0xa39   : > { %v2931_v60 = vmul.f32 1.442695, %v2929_v62 }
 0xa3a   : > { %4242 = vpow2.f32 %v2933_v29 }
 0xa3b   : > { %4244 = vpow2.f32 %v2931_v60 }
 0xa44   : > { %v4243_v13 = vpop.eup %4242 }
 0xa45   : > { %v4245_v61 = vpop.eup %4244  ;;  %v2938_v14 = vsel %vm961_vm7, %v4243_v13, 0.0 }
 0xa46   : > { %2939 = vadd.xlane.f32.xlu1 %v2938_v14  ;;  %v2935_v48 = vsel %vm961_vm7, %v4245_v61, 0.0 }
 0xa47   : > { %2936 = vadd.xlane.f32.xlu0 %v2935_v48  ;;  %v3682_v48 = vld [vmem:[%s5521_s13] ss:$0 sm:$0xff] }
 0xad3   : > { %v2940_v63 = vpop.xlane.xlu1 %2939 }
 0xad4   : > { %4246 = vrcp.f32 %v2940_v63  ;;  %v2937_v1 = vpop.xlane.xlu0 %2936 }
 0xad5   : > { %4248 = vrcp.f32 %v2937_v1 }
 0xade   : > { %v4247_v2 = vpop.eup %4246 }
 0xadf   : > { %v4249_v15 = vpop.eup %4248  ;;  %v2944_v3 = vmul.f32 %v4247_v2, %v4243_v13 }
 0xae0   : > { %v2942_v5 = vmul.f32 %v4249_v15, %v4245_v61  ;;  %v3683_v15 = vld [vmem:[%s5522_s14] ss:$0 sm:$0xff] }
 0xae1   : > { %v2949_v7 = vadd.f32 %v2947_v6, %v2944_v3 }
 0xae2   : > { %v2948_v17 = vadd.f32 %v2946_v16, %v2942_v5 }
 0xae4   : > { %3956 = vmatprep.mubr.msk.f32.mxu1 %vm961_vm7, %v2948_v17 }
 0xae5   : > { %3957 = vmatmul.mubr.msk.f32.vlgmr.msra.gmra.mrb[18].mxu1 %vm961_vm7, %v2949_v7  ;;  %v4175_v7 = vld [vmem:[%s5435_s17] sm:$0xff]  }
 0xae6   : > { %3975 = vmatprep.mubr.msk.bf16.mxu1 %vm4519_vm0, %v4518_v0 }
 0xbb8   : > { %v3958_v8 = vpop.f32.mrb[18].mxu1 }
 0xbb9   : > { %v3024_v18 = vpop.f32.mrb[19].mxu1  ;;  %v3040_v9 = vsel %vm961_vm7, %v3958_v8, 0.0 }
 0xbba   : > { %3041 = vadd.xlane.f32.xlu1 %v3040_v9  ;;  %v3037_v10 = vsel %vm961_vm7, %v3024_v18, 0.0 }
 0xbbb   : > { %3038 = vadd.xlane.f32.xlu0 %v3037_v10 }
 0xc47   : > { %v3042_v11 = vpop.xlane.xlu1 %3041 }
 0xc48   : > { %v3045_v12 = vmul.f32 0.0625, %v3042_v11  ;;  %v3039_v19 = vpop.xlane.xlu0 %3038 }
 0xc49   : > { %v3044_v20 = vmul.f32 0.0625, %v3039_v19 }
 0xc4a   : > { %v3047_v21 = vsub.f32 %v3958_v8, %v3045_v12  ;;  %v4176_v8 = vld [vmem:[%s5435_s17 + $0x8] sm:$0xff]  }
 0xc4b   : > { %v3046_v22 = vsub.f32 %v3024_v18, %v3044_v20  ;;  %v3684_v18 = vld [vmem:[%s5434_s16] ss:$0 sm:$0xff] }
 0xc4c   : > { %v3049_v23 = vmul.f32 %v3047_v21, %v3047_v21 }
 0xc4d   : > { %v3048_v26 = vmul.f32 %v3046_v22, %v3046_v22 }
 0xc4e   : > { %v3053_v35 = vsel %vm961_vm7, %v3049_v23, 0.0 }
 0xc4f   : > { %3054 = vadd.xlane.f32.xlu1 %v3053_v35  ;;  %v3050_v36 = vsel %vm961_vm7, %v3048_v26, 0.0 }
 0xc50   : > { %3051 = vadd.xlane.f32.xlu0 %v3050_v36 }
 0xcdc   : > { %v3055_v38 = vpop.xlane.xlu1 %3054 }
 0xcdd   : > { %v3057_v39 = vmul.f32 0.0625, %v3055_v38  ;;  %v3052_v40 = vpop.xlane.xlu0 %3051 }
 0xcde   : > { %v3056_v41 = vmul.f32 0.0625, %v3052_v40 }
 0xcdf   : > { %v3059_v42 = vadd.f32 1e-05, %v3057_v39 }
 0xce0   : > { %v3058_v43 = vadd.f32 1e-05, %v3056_v41 }
 0xce1   : > { %4250 = vrsqrt.f32 %v3059_v42 }
 0xce2   : > { %4252 = vrsqrt.f32 %v3058_v43 }
 0xceb   : > { %v4251_v44 = vpop.eup %4250 }
 0xcec   : > { %v4253_v46 = vpop.eup %4252  ;;  %v3063_v47 = vmul.f32 %v4251_v44, %v3047_v21 }
 0xced   : > { %v3062_v49 = vmul.f32 %v4253_v46, %v3046_v22 }
 0xcee   : > { %v3071_v50 = vmul.f32 %v3680_v30, %v3063_v47 }
 0xcef   : > { %v3070_v28 = vmul.f32 %v3680_v30, %v3062_v49 }
 0xcf0   : > { %v3079_v51 = vadd.f32 %v3681_v27, %v3071_v50 }
 0xcf1   : > { %v3078_v31 = vadd.f32 %v3681_v27, %v3070_v28 }
 0xcf2   : > { %v3081_v52 = vadd.f32 %v3079_v51, %v4935_v37 }
 0xcf3   : > { %v3080_v54 = vadd.f32 %v3078_v31, %v4927_v33  ;;  %v4174_v33 = vld [vmem:[%s5520_s15] sm:$0xff]  }
 0xcf4   : > { %v3087_v32 = vsel %vm961_vm7, %v3081_v52, 0.0  ;;  %3960 = vmatpush3.bf16.msra.mxu0 %v4174_v33 }
 0xcf5   : > { %3088 = vadd.xlane.f32.xlu1 %v3087_v32  ;;  %v3084_v45 = vsel %vm961_vm7, %v3080_v54, 0.0  ;;  %3965 = vmatprep.subr.bf16.mxu0 %v4518_v0 }
 0xcf6   : > { %3085 = vadd.xlane.f32.xlu0 %v3084_v45 }
 0xd82   : > { %v3089_v57 = vpop.xlane.xlu1 %3088 }
 0xd83   : > { %v3091_v58 = vmul.f32 0.0625, %v3089_v57  ;;  %v3086_v59 = vpop.xlane.xlu0 %3085 }
 0xd84   : > { %v3090_v25 = vmul.f32 0.0625, %v3086_v59 }
 0xd85   : > { %v3093_v55 = vsub.f32 %v3081_v52, %v3091_v58 }
 0xd86   : > { %v3092_v56 = vsub.f32 %v3080_v54, %v3090_v25  ;;  %v4177_v54 = vld [vmem:[%s5439_s21] sm:$0xff]  }
 0xd87   : > { %v3095_v53 = vmul.f32 %v3093_v55, %v3093_v55  ;;  %3974 = vmatpush3.bf16.msra.mxu1 %v4177_v54 }
 0xd88   : > { %v3094_v4 = vmul.f32 %v3092_v56, %v3092_v56 }
 0xd89   : > { %v3099_v34 = vsel %vm961_vm7, %v3095_v53, 0.0 }
 0xd8a   : > { %3100 = vadd.xlane.f32.xlu1 %v3099_v34  ;;  %v3096_v37 = vsel %vm961_vm7, %v3094_v4, 0.0  ;;  %v3692_v34 = vld [vmem:[%s5524_s20] ss:$0 sm:$0xff]  ;;  %s5310_s20 = scalar_lea.sflag [#allocation12], %s3377_s29 }
 0xd8b   : > { %3097 = vadd.xlane.f32.xlu0 %v3096_v37 }
 0xe17   : > { %v3101_v24 = vpop.xlane.xlu1 %3100 }
 0xe18   : > { %v3103_v62 = vmul.f32 0.0625, %v3101_v24  ;;  %v3098_v29 = vpop.xlane.xlu0 %3097 }
 0xe19   : > { %v3102_v60 = vmul.f32 0.0625, %v3098_v29 }
 0xe1a   : > { %v3105_v13 = vadd.f32 1e-05, %v3103_v62 }
 0xe1b   : > { %v3104_v61 = vadd.f32 1e-05, %v3102_v60 }
 0xe1c   : > { %4254 = vrsqrt.f32 %v3105_v13 }
 0xe1d   : > { %4256 = vrsqrt.f32 %v3104_v61 }
 0xe26   : > { %v4255_v14 = vpop.eup %4254 }
 0xe27   : > { %v4257_v63 = vpop.eup %4256  ;;  %v3109_v1 = vmul.f32 %v4255_v14, %v3093_v55 }
 0xe28   : > { %v3108_v2 = vmul.f32 %v4257_v63, %v3092_v56  ;;  %v3691_v56 = vld [vmem:[%s5523_s23] ss:$0 sm:$0xff] }
 0xe29   : > { %v3117_v3 = vmul.f32 %v3682_v48, %v3109_v1 }
 0xe2a   : > { %v3116_v16 = vmul.f32 %v3682_v48, %v3108_v2 }
 0xe2b   : > { %v3125_v5 = vadd.f32 %v3683_v15, %v3117_v3 }
 0xe2c   : > { %v3124_v6 = vadd.f32 %v3683_v15, %v3116_v16 }
 0xe2e   : > { %v3128_v17 = vpack.c.bf16 %v3125_v5, %v3124_v6 }
 0xe30   : > { %3962 = vmatmul.mubr.msk.bf16.vlgmr.msra.gmra.mrb[32].mxu0 %vm961_vm7, %v3128_v17 }
 0xe31   : > { %3969 = vmatprep.mubr.msk.bf16.mxu0 %vm4519_vm0, %v4518_v0  ;;  %3966 = vmatpush3.bf16.msra.mxu0 %v4175_v7  ;;  %vm3212_vm0 = vcmask 261120  }
 0xe32   : > { %3967 = vmatprep.subr.bf16.mxu0 %v4518_v0  ;;  %v3687_v0 = vld [vmem:[%s5436_s18] ss:$0 sm:$0xff] }
 0xe35   : > { %3968 = vmatpush3.bf16.msra.mxu0 %v4176_v8 }
 0xf03   : > { %v3179_v9 = vpop.f32.mrb[32].mxu0 }
 0xf04   : > { %v3180_v10 = vadd.f32 %v3684_v18, %v3179_v9  ;;  %v3963_v11 = vpop.f32.mrb[33].mxu0 }
 0xf05   : > { %v3182_v12 = vpop.f32.mrb[34].mxu0 }
 0xf06   : > { %v3183_v19 = vadd.f32 %v3684_v18, %v3182_v12  ;;  %v3964_v20 = vpop.f32.mrb[35].mxu0  ;;  %v3186_v21 = vmax.f32 %v3180_v10, 0.0 }
 0xf08   : > { %v3187_v22 = vmax.f32 %v3183_v19, 0.0 }
 0xf0a   : > { %v3192_v23 = vpack.c.bf16 %v3187_v22, %v3186_v21 }
 0xf0c   : > { %3970 = vmatmul.mubr.msk.bf16.vlgmr.msra.gmra.mrb[36].mxu0 %vm3212_vm0, %v3192_v23 }
 0xfdf   : > { %v3250_v26 = vpop.f32.mrb[36].mxu0 }
 0xfe0   : > { %v3251_v35 = vadd.f32 %v3687_v0, %v3250_v26  ;;  %v3971_v36 = vpop.f32.mrb[37].mxu0 }
 0xfe1   : > { %v3253_v38 = vpop.f32.mrb[38].mxu0 }
 0xfe2   : > { %v3254_v39 = vadd.f32 %v3687_v0, %v3253_v38  ;;  %v3972_v40 = vpop.f32.mrb[39].mxu0  ;;  %v3257_v41 = vadd.f32 %v3251_v35, %v3124_v6 }
 0xfe4   : > { %v3261_v42 = vsel %vm961_vm7, %v3257_v41, 0.0  ;;  %v3258_v43 = vadd.f32 %v3254_v39, %v3125_v5 }
 0xfe5   : > { %3262 = vadd.xlane.f32.xlu0 %v3261_v42 }
 0xfe6   : > { %v3264_v44 = vsel %vm961_vm7, %v3258_v43, 0.0 }
 0xfe7   : > { %3265 = vadd.xlane.f32.xlu1 %v3264_v44 }
0x1072   : > { %v3263_v30 = vpop.xlane.xlu0 %3262 }
0x1073   : > { %v3267_v46 = vmul.f32 0.0625, %v3263_v30 }
0x1074   : > { %v3266_v47 = vpop.xlane.xlu1 %3265 }
0x1075   : > { %v3269_v27 = vsub.f32 %v3257_v41, %v3267_v46  ;;  %v3268_v49 = vmul.f32 0.0625, %v3266_v47 }
0x1077   : > { %v3270_v50 = vsub.f32 %v3258_v43, %v3268_v49  ;;  %v3271_v28 = vmul.f32 %v3269_v27, %v3269_v27 }
0x1079   : > { %v3273_v51 = vsel %vm961_vm7, %v3271_v28, 0.0  ;;  %v3272_v31 = vmul.f32 %v3270_v50, %v3270_v50 }
0x107a   : > { %3274 = vadd.xlane.f32.xlu0 %v3273_v51 }
0x107b   : > { %v3276_v52 = vsel %vm961_vm7, %v3272_v31, 0.0 }
0x107c   : > { %3277 = vadd.xlane.f32.xlu1 %v3276_v52 }
0x1107   : > { %v3275_v32 = vpop.xlane.xlu0 %3274 }
0x1108   : > { %v3279_v45 = vmul.f32 0.0625, %v3275_v32 }
0x1109   : > { %v3278_v57 = vpop.xlane.xlu1 %3277 }
0x110a   : > { %v3281_v58 = vadd.f32 1e-05, %v3279_v45  ;;  %v3280_v59 = vmul.f32 0.0625, %v3278_v57 }
0x110c   : > { %4258 = vrsqrt.f32 %v3281_v58  ;;  %v3282_v25 = vadd.f32 1e-05, %v3280_v59 }
0x110e   : > { %4260 = vrsqrt.f32 %v3282_v25 }
0x1116   : > { %v4259_v55 = vpop.eup %4258 }
0x1117   : > { %v3285_v53 = vmul.f32 %v4259_v55, %v3269_v27 }
0x1118   : > { %v4261_v4 = vpop.eup %4260 }
0x1119   : > { %v3293_v37 = vmul.f32 %v3691_v56, %v3285_v53  ;;  %v3286_v33 = vmul.f32 %v4261_v4, %v3270_v50 }
0x111b   : > { %v3301_v24 = vadd.f32 %v3692_v34, %v3293_v37  ;;  %v3294_v62 = vmul.f32 %v3691_v56, %v3286_v33 }
0x111d   : > { %v3302_v29 = vadd.f32 %v3692_v34, %v3294_v62  ;;  %3313 = vst.msk [vmem:[%s5291_s5] sm:$0xff] %vm961_vm7, %v3301_v24  ;;  %v3303_v60 = vsel %vm961_vm7, %v3301_v24, 0.0 }
0x111f   : > { %v3304_v13 = vsel %vm961_vm7, %v3302_v29, 0.0  ;;  %3314 = vst.msk [vmem:[%s5291_s5 + $0x8] sm:$0xff] %vm961_vm7, %v3302_v29 }
0x1120   : > { %v3305_v61 = vadd.f32 %v3304_v13, %v3303_v60 }
0x1122   : > { %v3306_v14 = vrot.slane %v3305_v61, 4 }
0x1124   : > { %v3307_v48 = vadd.f32 %v3306_v14, %v3305_v61 }
0x1126   : > { %v3308_v63 = vrot.slane %v3307_v48, 2 }
0x1128   : > { %v3309_v1 = vadd.f32 %v3308_v63, %v3307_v48 }
0x112a   : > { %v3310_v2 = vrot.slane %v3309_v1, 1 }
0x112c   : > { %v3311_v15 = vadd.f32 %v3310_v2, %v3309_v1 }
0x112e   : > { %v3312_v3 = vmul.f32 0.0625, %v3311_v15 }
0x1130   : > { %v3319_v16 = vpack.c.bf16 %v3312_v3, %v3312_v3  ;;  %3316 = vst.msk [vmem:[%s841_s0] sm:$0x1] %vm3315_vm4, %v3312_v3 }
0x1132   : > { %3976 = vmatmul.mubr.msk.bf16.vlgmr.msra.gmra.mrb[24].mxu1 %vm961_vm7, %v3319_v16 }
0x1133   : > { %4389 = shalt.err (!%p4386_p5)
}
0x1134   : > { %s4390_s0 = scalar_lea.hbm %s5308_s4, 16  ;;  %s4394_s10 = scalar_lea.hbm %s5525_s8, 32 }
0x1135   : > { %p4391_p0 = scmp.ne.s32.totalorder %s5308_s4, %s4390_s0  ;;  %p4395_p12 = scmp.lt.u32.totalorder %s5308_s4, %s5525_s8 }
0x1136   : > { %p4396_p2 = scmp.lt.u32.totalorder %s4394_s10, %s4390_s0  ;;  %p4398_p4 = scmp.lt.u32.totalorder %s4390_s0, %s5308_s4 }
0x1137   : > { %p4392_p9 = pnand %p4391_p0, %p4796_p6 }
0x1138   : > { %p4397_p1 = por %p4396_p2, %p4395_p12 }
0x1139   : > { %p4393_p11 = pneg %p4392_p9 }
0x113a   : > { %p4399_p8 = por %p4398_p4, %p4397_p1 }
0x113c   : > { %p4400_p3 = pnand %p4399_p8, %p4393_p11 }
0x113e   : > { %4403 = shalt.err (!%p4400_p3)
}
0x113f   : > { %4088 = dma.vmem_to_hbm [thread:$0]  (%p4796_p6), %s3411_s19, 16, %s5308_s4, %s5310_s20  }
0x1140   : > { %s3703_s12 = sshll.u32 %s4677_s7, 8  ;;  %s3394_s9 = sshll.u32 %s5291_s5, 4  ;;  %s5337_s9 = int_to_ptr.vmem [resolvable:$true] %s3394_s9 }
0x1141   : > { %s5526_s23 = sld [smem:[#allocation40_spill]]  ;;  %s3373_s0 = scalar_lea.sflag [#allocation4], %s4841_s28 }
0x1142   : > { %s4404_s11 = scalar_lea.vmem %s5337_s9, 256  ;;  %s4522_s3 = smov [#allocation10]  }
0x1143   : > { %p4405_p7 = scmp.ne.s32.totalorder %s5337_s9, %s4404_s11  ;;  %s4408_s4 = sshll.u32 %s4522_s3, 4  ;;  %s4409_s4 = int_to_ptr.vmem [resolvable:$false] %s4408_s4 }
0x1144   : > { %s4410_s5 = scalar_lea.vmem %s4409_s4, 512  ;;  %p4411_p5 = scmp.lt.s32.totalorder %s5337_s9, %s4409_s4 }
0x1145   : > { %p4406_p10 = pnand %p4405_p7, %p4796_p6  ;;  %p4412_p0 = scmp.lt.s32.totalorder %s4410_s5, %s4404_s11 }
0x1147   : > { %s5335_s10 = scalar_lea.hbm %s5526_s23, %s3703_s12  ;;  %p4407_p13 = pneg %p4406_p10 }
0x1148   : > { %p4413_p9 = por %p4412_p0, %p4411_p5 }
0x114a   : > { %p4414_p11 = pnand %p4413_p9, %p4407_p13 }
0x114c   : > { %4417 = shalt.err (!%p4414_p11)
}
0x114d   : > { %s4418_s19 = scalar_lea.hbm %s5335_s10, 256  ;;  %s4422_s3 = scalar_lea.hbm %s5526_s23, 512 }
0x114e   : > { %p4419_p12 = scmp.ne.s32.totalorder %s5335_s10, %s4418_s19  ;;  %p4423_p4 = scmp.lt.u32.totalorder %s5335_s10, %s5526_s23 }
0x114f   : > { %p4424_p8 = scmp.lt.u32.totalorder %s4422_s3, %s4418_s19  ;;  %p4426_p7 = scmp.lt.u32.totalorder %s4418_s19, %s5335_s10 }
0x1150   : > { %p4420_p2 = pnand %p4419_p12, %p4796_p6 }
0x1151   : > { %p4425_p3 = por %p4424_p8, %p4423_p4 }
0x1152   : > { %p4421_p1 = pneg %p4420_p2 }
0x1153   : > { %p4427_p10 = por %p4426_p7, %p4425_p3 }
0x1155   : > { %p4428_p13 = pnand %p4427_p10, %p4421_p1 }
0x1157   : > { %4431 = shalt.err (!%p4428_p13)
}
0x1158   : > { %s4523_s11 = smov 128   ;;  %s4524_s5 = smov 8   ;;  %vm3370_vm7 = vcmask 81920  }
0x1159   : > { %4087 = dma.vmem_to_hbm [thread:$0]  (%p4796_p6), %s5337_s9, 256, %s5335_s10, %s3373_s0, %s4523_s11, %s4523_s11, %s4524_s5  }
0x115a   : > { %s5527_s3 = sld [smem:[#allocation39_spill]]  ;;  %s847_s19 = scalar_lea.vmem [#allocation13], %s4841_s28 }
0x115b   : > { %s3423_s26 = sshll.u32 %s847_s19, 4  ;;  %s5528_s4 = sshll.u32 %s4677_s7, 4  ;;  %s5374_s26 = int_to_ptr.vmem [resolvable:$true] %s3423_s26 }
0x115c   : > { %s5529_s14 = sld [smem:[#allocation42_spill]]  ;;  %s4432_s28 = scalar_lea.vmem %s5374_s26, 16 }
0x115d   : > { %p4433_p5 = scmp.ne.s32.totalorder %s5374_s26, %s4432_s28  ;;  %s4525_s9 = smov [#allocation13]  }
0x115e   : > { %s4436_s7 = sshll.u32 %s4525_s9, 4  ;;  %s4437_s7 = int_to_ptr.vmem [resolvable:$false] %s4436_s7 }
0x115f   : > { %p4434_p0 = pnand %p4433_p5, %p4796_p6  ;;  %s4438_s10 = scalar_lea.vmem %s4437_s7, 32 }
0x1160   : > { %v3320_v5 = vld [vmem:[%s5527_s3] sm:$0x1]  ;;  %p4439_p11 = scmp.lt.s32.totalorder %s5374_s26, %s4437_s7  ;;  %p4440_p12 = scmp.lt.s32.totalorder %s4438_s10, %s4432_s28 }
0x1161   : > { %p4435_p9 = pneg %p4434_p0 }
0x1162   : > { %s5372_s15 = scalar_lea.hbm %s5529_s14, %s5528_s4  ;;  %p4441_p2 = por %p4440_p12, %p4439_p11 }
0x1164   : > { %p4442_p1 = pnand %p4441_p2, %p4435_p9 }
0x1205   : > { %v3364_v6 = vpop.f32.mrb[24].mxu1 }
0x1206   : > { %v3365_v17 = vadd.f32 %v3364_v6, %v3320_v5  ;;  %v3977_v7 = vpop.f32.mrb[25].mxu1 }
0x1207   : > { %v3367_v8 = vpop.f32.mrb[26].mxu1 }
0x1208   : > { %v3978_v18 = vpop.f32.mrb[27].mxu1  ;;  %3371 = vst.msk [vmem:[%s847_s19] sm:$0x1] %vm3370_vm7, %v3365_v17 }
0x1209   : > { %4445 = shalt.err (!%p4442_p1)
}
0x120a   : > { %s4446_s13 = scalar_lea.hbm %s5372_s15, 16  ;;  %s4450_s11 = scalar_lea.hbm %s5529_s14, 32 }
0x120b   : > { %p4447_p4 = scmp.ne.s32.totalorder %s5372_s15, %s4446_s13  ;;  %p4451_p7 = scmp.lt.u32.totalorder %s5372_s15, %s5529_s14 }
0x120c   : > { %p4452_p10 = scmp.lt.u32.totalorder %s4450_s11, %s4446_s13  ;;  %p4454_p5 = scmp.lt.u32.totalorder %s4446_s13, %s5372_s15 }
0x120d   : > { %p4448_p8 = pnand %p4447_p4, %p4796_p6 }
0x120e   : > { %p4453_p13 = por %p4452_p10, %p4451_p7 }
0x120f   : > { %p4449_p3 = pneg %p4448_p8 }
0x1210   : > { %p4455_p0 = por %p4454_p5, %p4453_p13 }
0x1212   : > { %p4456_p9 = pnand %p4455_p0, %p4449_p3 }
0x1214   : > { %4459 = shalt.err (!%p4456_p9)
}
0x1215   : > { %4089 = dma.vmem_to_hbm [thread:$0]  (%p4796_p6), %s5374_s26, 16, %s5372_s15, %s5310_s20  }
0x1216 PF: > { %s5530_s29 = sld [smem:[#allocation19_spill]]  ;;  %s5531_s3 = sld [smem:[#allocation20_spill]] }
0x1217   : > { %p5533_p12 = scmp.ge.s32.totalorder %s4510_s30, 2 }
0x121c   : > { %s3435_s19 = sand.u32 1, %s5530_s29   ;;  %p5532_p11 = scmp.ne.s32.totalorder %s5531_s3, 0 }
0x121d   : > { %s3436_s4 = scalar_lea.sflag [#allocation4], %s3435_s19 }
0x121e   : > { %p4108_p2 = pnand %p5533_p12, %p5532_p11 }
0x1220   : > { %4489 = dma.done.wait (!%p4108_p2), %s3436_s4, 256  }
0x1221   : > { %4491 = vsyncadd (!%p4108_p2), %s3436_s4, 4294967040  ;;  %s5534_s28 = sadd.s32 4294967294, %s4510_s30  }
0x1222   : > { %s3444_s9 = sand.u32 1, %s5534_s28  }
0x1223   : > { %s3445_s7 = scalar_lea.sflag [#allocation12], %s3444_s9 }
0x1224   : > { %4493 = dma.done.wait (!%p4108_p2), %s3445_s7, 32  }
0x1225   : > { %4495 = vsyncadd (!%p4108_p2), %s3445_s7, 4294967264  ;;  %p44_p6 = scmp.ge.s32.totalorder %s4782_s27, 4   ;;  %s5535_s29 = smov %s4502_s2 }
0x1226   : > { %s5536_s2 = smov %s4506_s6  ;;  %s5537_s6 = smov %s4792_s1 }
0x1227   : > { %s5538_s30 = smov %s4782_s27  ;;  %46 = sbr.rel (!%p44_p6) target bundleno = 32 (0x20), region = 213 }
0x122e   :  { %3457 = vsyncpa [#allocation3], 1 }
0x122f   :  { %3459 = vsyncpa [#allocation3 + $0x1], 1 }
0x1230   :  { %3460 = vsyncpa [#allocation6], 1 }
0x1231   :  { %3461 = vsyncpa [#allocation9], 1 }
0x1232   :  { %3462 = vsyncpa [#allocation4], 1 }
0x1233   :  { %3464 = vsyncpa [#allocation4 + $0x1], 1 }
0x1234   :  { %3465 = vsyncpa [#allocation12], 1 }
0x1235   :  { %3467 = vsyncpa [#allocation12 + $0x1], 1 }

</bundles_post_ra>
